<compile_context>
chip_gen: v6e
topology: v6e:2x2x1
jax: 0.10.0
libtpu: 0.0.40
codegen_flags: <defaults>
</compile_context>

<pallas_src>
import functools

import jax
import jax.numpy as jnp
from jax.experimental import pallas as pl
from jax.experimental.pallas import tpu as pltpu

NEG_INF = -1e30   # bias for padded fc2 columns -> softmax prob exactly 0
FC1_PAD = 512     # fc1 output columns padded 432 -> 512 (lane-dense h2, clean K for fc2)
FC2_PAD = 128     # fc2 output columns padded action_size -> 128


def _round_up(x, m):
    return (x + m - 1) // m * m


def _pick_tb(batch):
    # Full MXU row occupancy wants 128 rows (consider 256 on v6e/v7x when the
    # batch allows a grid >= 2 so both v7x TensorCores stay busy); for tiny
    # batches only round up to the 8-sublane minimum instead of padding to 128.
    return min(128, _round_up(batch, 8))


# ---------------------------------------------------------------------------
# Fused kernel: conv1-3 (2x2/s1) + relu, fc1 + relu, fc2 + softmax.
# Input arrives as a (TB, H*W*C) row with lane index = (h*W + w)*C + c.
# ---------------------------------------------------------------------------
def _actor_kernel(x_ref, w1_ref, b1_ref, w2_ref, b2_ref, w3_ref, b3_ref,
                  fw1_ref, fb1_ref, fw2_ref, fb2_ref, o_ref, *, H, W):
    TB = x_ref.shape[0]
    H1, W1 = H - 1, W - 1          # conv1 output grid (3x3 for a 4x4 input)
    H2, W2 = H - 2, W - 2          # conv2 output grid (2x2)
    O1 = w2_ref.shape[0] // 4      # conv1 out channels (128)

    x = x_ref[...].astype(jnp.bfloat16)                          # (TB, H*W*C)

    # ---- conv1: ONE lowered GEMM covering all H1*W1 output positions ----
    y1 = jnp.dot(x, w1_ref[...], preferred_element_type=jnp.float32)
    a1 = jnp.maximum(y1 + b1_ref[...], 0.0).astype(jnp.bfloat16)  # (TB, H1*W1*O1)

    def a1_tile(h, w):             # 128-lane-aligned slice -> full-vreg, cheap
        p = h * W1 + w
        return a1[:, p * O1:(p + 1) * O1]

    # ---- conv2: stack the H2*W2 patches along sublanes -> ONE GEMM ----
    patches = [jnp.concatenate([a1_tile(oh + di, ow + dj)
                                for di in range(2) for dj in range(2)], axis=-1)
               for oh in range(H2) for ow in range(W2)]           # each (TB, 4*O1)
    y2 = jnp.dot(jnp.concatenate(patches, axis=0), w2_ref[...],
                 preferred_element_type=jnp.float32)              # (H2*W2*TB, 256)
    a2 = jnp.maximum(y2 + b2_ref[...], 0.0).astype(jnp.bfloat16)

    # ---- conv3: single output position -> one GEMM on the full 2x2 patch ----
    p3 = jnp.concatenate([a2[(di * W2 + dj) * TB:(di * W2 + dj + 1) * TB, :]
                          for di in range(2) for dj in range(2)], axis=-1)
    y3 = jnp.dot(p3, w3_ref[...], preferred_element_type=jnp.float32)
    h1 = jnp.maximum(y3 + b3_ref[...], 0.0).astype(jnp.bfloat16)  # (TB, 384) == flatten

    # ---- fc1 (output lane-padded to 512) + relu ----
    h2 = jnp.dot(h1, fw1_ref[...], preferred_element_type=jnp.float32) + fb1_ref[...]
    h2 = jnp.maximum(h2, 0.0).astype(jnp.bfloat16)
    # TODO(synk): nn.Dropout(0.2) is identity in eval mode; training-mode RNG
    # dropout (pltpu.prng_seed / prng_random_bits masking) not implemented.

    # ---- fc2 (lane-padded to 128) + numerically stable, exact softmax ----
    logits = (jnp.dot(h2, fw2_ref[...], preferred_element_type=jnp.float32)
              + fb2_ref[...])
    m = jnp.max(logits, axis=-1, keepdims=True)
    e = jnp.exp(logits - m)
    o_ref[...] = (e / jnp.sum(e, axis=-1, keepdims=True)).astype(o_ref.dtype)


def _actor_pallas(kp, x_flat, B_pad, TB, feat, H, W):
    n_lane = kp["fc2_w"].shape[1]
    kernel = functools.partial(_actor_kernel, H=H, W=W)
    row = lambda i: (i, 0)       # batch-tiled arrays
    const = lambda i: (0, 0)     # VMEM-resident weights/biases (constant index_map)
    wspec = lambda a: pl.BlockSpec(a.shape, const)
    # (pipeline_mode=pl.Buffered(1) on the constant weight specs would save the
    # unused second pipeline buffer; skipped for broad jax-version compatibility.)
    return pl.pallas_call(
        kernel,
        out_shape=jax.ShapeDtypeStruct((B_pad, n_lane), jnp.float32),
        grid_spec=pltpu.PrefetchScalarGridSpec(
            num_scalar_prefetch=0,
            grid=(B_pad // TB,),
            in_specs=[
                pl.BlockSpec((TB, feat), row),
                wspec(kp["conv1_w"]), wspec(kp["conv1_b"]),
                wspec(kp["conv2_w"]), wspec(kp["conv2_b"]),
                wspec(kp["conv3_w"]), wspec(kp["conv3_b"]),
                wspec(kp["fc1_w"]), wspec(kp["fc1_b"]),
                wspec(kp["fc2_w"]), wspec(kp["fc2_b"]),
            ],
            out_specs=pl.BlockSpec((TB, n_lane), row),
        ),
        compiler_params=pltpu.CompilerParams(
            dimension_semantics=("parallel",)),
    )(x_flat, kp["conv1_w"], kp["conv1_b"], kp["conv2_w"], kp["conv2_b"],
      kp["conv3_w"], kp["conv3_b"], kp["fc1_w"], kp["fb1"] if False else kp["fc1_b"],
      kp["fc2_w"], kp["fc2_b"])


@functools.partial(jax.jit, static_argnames=("action_size",))
def actor_forward(kparams, x_nchw, action_size):
    """x_nchw: (B, C, H, W) f32 -> action probabilities (B, action_size)."""
    B, C, H, W = x_nchw.shape
    assert H == 4 and W == 4, "fc1=Linear(384,432) implies a 4x4 spatial input"
    # NCHW -> NHWC -> per-sample flat row with lane index (h*W + w)*C + c.
    x = jnp.transpose(x_nchw, (0, 2, 3, 1)).reshape(B, H * W * C)
    x = x.astype(jnp.float32)
    TB = _pick_tb(B)
    B_pad = _round_up(B, TB)
    if B_pad != B:
        x = jnp.pad(x, ((0, B_pad - B), (0, 0)))
    out = _actor_pallas(kparams, x, B_pad, TB, H * W * C, H, W)
    return out[:B, :action_size]


# ---------------------------------------------------------------------------
# One-time parameter layout prep (hoisted out of the forward pass)
# ---------------------------------------------------------------------------
def prepare_params(params, action_size, H=4, W=4):
    conv1_w = params["conv1_w"]                         # (128, C, 2, 2)
    O1, C = conv1_w.shape[0], conv1_w.shape[1]
    H1, W1 = H - 1, W - 1

    # conv1 "lowered" weight (H*W*C, H1*W1*O1): column block p = oh*W1+ow only
    # has its 4 taps' Cin rows nonzero -> one GEMM yields all 9 output positions.
    big = jnp.zeros((H * W * C, H1 * W1 * O1), jnp.float32)
    for oh in range(H1):
        for ow in range(W1):
            p = oh * W1 + ow
            for di in range(2):
                for dj in range(2):
                    r0 = ((oh + di) * W + (ow + dj)) * C
                    big = big.at[r0:r0 + C, p * O1:(p + 1) * O1].set(
                        conv1_w[:, :, di, dj].T)
    conv1_b_big = jnp.tile(params["conv1_b"].astype(jnp.float32), H1 * W1)

    def conv_mat(w):  # (O, Cin, 2, 2) -> (4*Cin, O) bf16, rows ordered tap-major
        taps = [w[:, :, di, dj].T for di in range(2) for dj in range(2)]
        return jnp.concatenate(taps, axis=0).astype(jnp.bfloat16)

    def bias_row(b, n=None, fill=0.0):
        b = b.astype(jnp.float32)
        if n is not None and n > b.shape[0]:
            b = jnp.pad(b, (0, n - b.shape[0]), constant_values=fill)
        return b.reshape(1, -1)

    # fc1: (432, 384) -> (384, 512): zero-padded output columns (lane-dense h2).
    fw1 = jnp.pad(params["fc1_w"].T.astype(jnp.float32),
                  ((0, 0), (0, FC1_PAD - params["fc1_w"].shape[0])))
    # fc2: (A, 432) -> (512, 128): zero rows for the padded fc1 columns, zero
    # columns + NEG_INF bias for the padded actions (softmax prob exactly 0).
    fw2 = jnp.pad(params["fc2_w"].T.astype(jnp.float32),
                  ((0, FC1_PAD - params["fc2_w"].shape[1]),
                   (0, FC2_PAD - action_size)))

    return {
        "conv1_w": big.astype(jnp.bfloat16),            # (H*W*C, 1152)
        "conv1_b": bias_row(conv1_b_big),               # (1, 1152)
        "conv2_w": conv_mat(params["conv2_w"]),         # (512, 256)
        "conv2_b": bias_row(params["conv2_b"]),
        "conv3_w": conv_mat(params["conv3_w"]),         # (1024, 384)
        "conv3_b": bias_row(params["conv3_b"]),
        "fc1_w": fw1.astype(jnp.bfloat16),              # (384, 512)
        "fc1_b": bias_row(params["fc1_b"], FC1_PAD, 0.0),
        "fc2_w": fw2.astype(jnp.bfloat16),              # (512, 128)
        "fc2_b": bias_row(params["fc2_b"], FC2_PAD, NEG_INF),
    }


# ---------------------------------------------------------------------------
# Deterministic parameter init (PyTorch shapes; uniform +-1/sqrt(fan_in))
# ---------------------------------------------------------------------------
def init_params(key, in_channels, action_size):
    ks = jax.random.split(key, 10)

    def u(k, shape, fan_in):
        bound = 1.0 / (fan_in ** 0.5)
        return jax.random.uniform(k, shape, jnp.float32, -bound, bound)

    return {
        "conv1_w": u(ks[0], (128, in_channels, 2, 2), in_channels * 4),
        "conv1_b": u(ks[1], (128,), in_channels * 4),
        "conv2_w": u(ks[2], (256, 128, 2, 2), 128 * 4),
        "conv2_b": u(ks[3], (256,), 128 * 4),
        "conv3_w": u(ks[4], (384, 256, 2, 2), 256 * 4),
        "conv3_b": u(ks[5], (384,), 256 * 4),
        "fc1_w": u(ks[6], (432, 384), 384),   # PyTorch Linear: (out, in)
        "fc1_b": u(ks[7], (432,), 384),
        "fc2_w": u(ks[8], (action_size, 432), 432),
        "fc2_b": u(ks[9], (action_size,), 432),
    }


# ---------------------------------------------------------------------------
# Pure-JAX reference of the PyTorch module (eval mode) for a parity check.
# ---------------------------------------------------------------------------
def _ref_forward(params, x):
    def conv(y, w, b):
        y = jax.lax.conv_general_dilated(
            y, w, window_strides=(1, 1), padding="VALID",
            dimension_numbers=("NCHW", "OIHW", "NCHW"))
        return jax.nn.relu(y + b[None, :, None, None])
    y = conv(x, params["conv1_w"], params["conv1_b"])
    y = conv(y, params["conv2_w"], params["conv2_b"])
    y = conv(y, params["conv3_w"], params["conv3_b"])
    y = y.reshape(y.shape[0], -1)
    y = jax.nn.relu(y @ params["fc1_w"].T + params["fc1_b"])
    logits = y @ params["fc2_w"].T + params["fc2_b"]
    return jax.nn.softmax(logits, axis=-1)


if __name__ == "__main__":
    key = jax.random.PRNGKey(0)
    kp_key, kx = jax.random.split(key)

    # state_size = (C, 4, 4): three k=2/s=1 convs reduce 4x4 -> 1x1 (fc1 sees 384).
    C, H, W = 4, 4, 4
    action_size = 8

    params = init_params(kp_key, C, action_size)
    kparams = prepare_params(params, action_size, H, W)   # layout work done once

    # Small-batch run + parity check against the pure-JAX reference.
    x_small = jax.random.normal(kx, (2, C, H, W), jnp.float32)
    out = jax.block_until_ready(actor_forward(kparams, x_small, action_size))
    ref = _ref_forward(params, x_small)
    assert out.shape == (2, action_size)
    assert bool(jnp.all(jnp.isfinite(out)))
    assert bool(jnp.allclose(jnp.sum(out, axis=-1), 1.0, atol=1e-3))
    assert bool(jnp.allclose(out, ref, atol=5e-2)), float(jnp.max(jnp.abs(out - ref)))

    # Larger batch exercises the performance path: TB=128, grid=2 (both v7x TCs).
    x_big = jax.random.normal(kx, (256, C, H, W), jnp.float32)
    out_big = jax.block_until_ready(actor_forward(kparams, x_big, action_size))
    assert out_big.shape == (256, action_size)
    assert bool(jnp.all(jnp.isfinite(out_big)))
    assert bool(jnp.allclose(jnp.sum(out_big, axis=-1), 1.0, atol=1e-3))

    print("KERNEL_OK")
</pallas_src>

<mosaic_0001>
module attributes {stable_mosaic.version = 11 : i64} {
  func.func @_actor_kernel(%arg0: i32, %arg1: memref<8x64xf32, #tpu.memory_space<vmem>>, %arg2: memref<64x1152xbf16, #tpu.memory_space<vmem>>, %arg3: memref<1x1152xf32, #tpu.memory_space<vmem>>, %arg4: memref<512x256xbf16, #tpu.memory_space<vmem>>, %arg5: memref<1x256xf32, #tpu.memory_space<vmem>>, %arg6: memref<1024x384xbf16, #tpu.memory_space<vmem>>, %arg7: memref<1x384xf32, #tpu.memory_space<vmem>>, %arg8: memref<384x512xbf16, #tpu.memory_space<vmem>>, %arg9: memref<1x512xf32, #tpu.memory_space<vmem>>, %arg10: memref<512x128xbf16, #tpu.memory_space<vmem>>, %arg11: memref<1x128xf32, #tpu.memory_space<vmem>>, %arg12: memref<8x128xf32, #tpu.memory_space<vmem>>) attributes {dimension_semantics = [#tpu.dimension_semantics<parallel>], iteration_bounds = array<i64: 1>, scalar_prefetch = 0 : i64, scratch_operands = 0 : i64, tpu.core_type = #tpu.core_type<tc>, window_params = [{transform_indices = @transform_0, window_bounds = array<i64: 8, 64>}, {pipeline_mode = #tpu.pipeline_mode<synchronous>, transform_indices = @transform_1, window_bounds = array<i64: 64, 1152>}, {pipeline_mode = #tpu.pipeline_mode<synchronous>, transform_indices = @transform_2, window_bounds = array<i64: 1, 1152>}, {pipeline_mode = #tpu.pipeline_mode<synchronous>, transform_indices = @transform_3, window_bounds = array<i64: 512, 256>}, {pipeline_mode = #tpu.pipeline_mode<synchronous>, transform_indices = @transform_4, window_bounds = array<i64: 1, 256>}, {pipeline_mode = #tpu.pipeline_mode<synchronous>, transform_indices = @transform_5, window_bounds = array<i64: 1024, 384>}, {pipeline_mode = #tpu.pipeline_mode<synchronous>, transform_indices = @transform_6, window_bounds = array<i64: 1, 384>}, {pipeline_mode = #tpu.pipeline_mode<synchronous>, transform_indices = @transform_7, window_bounds = array<i64: 384, 512>}, {pipeline_mode = #tpu.pipeline_mode<synchronous>, transform_indices = @transform_8, window_bounds = array<i64: 1, 512>}, {pipeline_mode = #tpu.pipeline_mode<synchronous>, transform_indices = @transform_9, window_bounds = array<i64: 512, 128>}, {pipeline_mode = #tpu.pipeline_mode<synchronous>, transform_indices = @transform_10, window_bounds = array<i64: 1, 128>}, {transform_indices = @transform_11, window_bounds = array<i64: 8, 128>}]} {
    %c0 = arith.constant 0 : index
    %c0_0 = arith.constant 0 : index
    %0 = vector.load %arg1[%c0, %c0_0] : memref<8x64xf32, #tpu.memory_space<vmem>>, vector<8x64xf32>
    %1 = arith.truncf %0 : vector<8x64xf32> to vector<8x64xbf16>
    %c0_1 = arith.constant 0 : index
    %c0_2 = arith.constant 0 : index
    %2 = vector.load %arg2[%c0_1, %c0_2] : memref<64x1152xbf16, #tpu.memory_space<vmem>>, vector<64x1152xbf16>
    %cst = arith.constant dense<0.000000e+00> : vector<8x1152xf32>
    %3 = tpu.matmul %1, %2, %cst {dimension_numbers = #tpu.dot_dimension_numbers<[1], [0], [0], [1], [0, 0, 1, 1], [], []>} : vector<8x64xbf16>, vector<64x1152xbf16>, vector<8x1152xf32> -> vector<8x1152xf32>
    %c0_3 = arith.constant 0 : index
    %c0_4 = arith.constant 0 : index
    %4 = vector.load %arg3[%c0_3, %c0_4] : memref<1x1152xf32, #tpu.memory_space<vmem>>, vector<1x1152xf32>
    %5 = vector.broadcast %4 : vector<1x1152xf32> to vector<8x1152xf32>
    %6 = arith.addf %3, %5 : vector<8x1152xf32>
    %cst_5 = arith.constant 0.000000e+00 : f32
    %7 = vector.broadcast %cst_5 : f32 to vector<8x1152xf32>
    %8 = arith.maximumf %6, %7 : vector<8x1152xf32>
    %9 = arith.truncf %8 : vector<8x1152xf32> to vector<8x1152xbf16>
    %10 = vector.extract_strided_slice %9 {offsets = [0, 0], sizes = [8, 128], strides = [1, 1]} : vector<8x1152xbf16> to vector<8x128xbf16>
    %11 = vector.extract_strided_slice %9 {offsets = [0, 128], sizes = [8, 128], strides = [1, 1]} : vector<8x1152xbf16> to vector<8x128xbf16>
    %12 = vector.extract_strided_slice %9 {offsets = [0, 384], sizes = [8, 128], strides = [1, 1]} : vector<8x1152xbf16> to vector<8x128xbf16>
    %13 = vector.extract_strided_slice %9 {offsets = [0, 512], sizes = [8, 128], strides = [1, 1]} : vector<8x1152xbf16> to vector<8x128xbf16>
    %14 = tpu.concatenate %10, %11, %12, %13 in 1 : vector<8x128xbf16>, vector<8x128xbf16>, vector<8x128xbf16>, vector<8x128xbf16> -> vector<8x512xbf16>
    %15 = vector.extract_strided_slice %9 {offsets = [0, 128], sizes = [8, 128], strides = [1, 1]} : vector<8x1152xbf16> to vector<8x128xbf16>
    %16 = vector.extract_strided_slice %9 {offsets = [0, 256], sizes = [8, 128], strides = [1, 1]} : vector<8x1152xbf16> to vector<8x128xbf16>
    %17 = vector.extract_strided_slice %9 {offsets = [0, 512], sizes = [8, 128], strides = [1, 1]} : vector<8x1152xbf16> to vector<8x128xbf16>
    %18 = vector.extract_strided_slice %9 {offsets = [0, 640], sizes = [8, 128], strides = [1, 1]} : vector<8x1152xbf16> to vector<8x128xbf16>
    %19 = tpu.concatenate %15, %16, %17, %18 in 1 : vector<8x128xbf16>, vector<8x128xbf16>, vector<8x128xbf16>, vector<8x128xbf16> -> vector<8x512xbf16>
    %20 = vector.extract_strided_slice %9 {offsets = [0, 384], sizes = [8, 128], strides = [1, 1]} : vector<8x1152xbf16> to vector<8x128xbf16>
    %21 = vector.extract_strided_slice %9 {offsets = [0, 512], sizes = [8, 128], strides = [1, 1]} : vector<8x1152xbf16> to vector<8x128xbf16>
    %22 = vector.extract_strided_slice %9 {offsets = [0, 768], sizes = [8, 128], strides = [1, 1]} : vector<8x1152xbf16> to vector<8x128xbf16>
    %23 = vector.extract_strided_slice %9 {offsets = [0, 896], sizes = [8, 128], strides = [1, 1]} : vector<8x1152xbf16> to vector<8x128xbf16>
    %24 = tpu.concatenate %20, %21, %22, %23 in 1 : vector<8x128xbf16>, vector<8x128xbf16>, vector<8x128xbf16>, vector<8x128xbf16> -> vector<8x512xbf16>
    %25 = vector.extract_strided_slice %9 {offsets = [0, 512], sizes = [8, 128], strides = [1, 1]} : vector<8x1152xbf16> to vector<8x128xbf16>
    %26 = vector.extract_strided_slice %9 {offsets = [0, 640], sizes = [8, 128], strides = [1, 1]} : vector<8x1152xbf16> to vector<8x128xbf16>
    %27 = vector.extract_strided_slice %9 {offsets = [0, 896], sizes = [8, 128], strides = [1, 1]} : vector<8x1152xbf16> to vector<8x128xbf16>
    %28 = vector.extract_strided_slice %9 {offsets = [0, 1024], sizes = [8, 128], strides = [1, 1]} : vector<8x1152xbf16> to vector<8x128xbf16>
    %29 = tpu.concatenate %25, %26, %27, %28 in 1 : vector<8x128xbf16>, vector<8x128xbf16>, vector<8x128xbf16>, vector<8x128xbf16> -> vector<8x512xbf16>
    %30 = tpu.concatenate %14, %19, %24, %29 in 0 : vector<8x512xbf16>, vector<8x512xbf16>, vector<8x512xbf16>, vector<8x512xbf16> -> vector<32x512xbf16>
    %c0_6 = arith.constant 0 : index
    %c0_7 = arith.constant 0 : index
    %31 = vector.load %arg4[%c0_6, %c0_7] : memref<512x256xbf16, #tpu.memory_space<vmem>>, vector<512x256xbf16>
    %cst_8 = arith.constant dense<0.000000e+00> : vector<32x256xf32>
    %32 = tpu.matmul %30, %31, %cst_8 {dimension_numbers = #tpu.dot_dimension_numbers<[1], [0], [0], [1], [0, 0, 1, 1], [], []>} : vector<32x512xbf16>, vector<512x256xbf16>, vector<32x256xf32> -> vector<32x256xf32>
    %c0_9 = arith.constant 0 : index
    %c0_10 = arith.constant 0 : index
    %33 = vector.load %arg5[%c0_9, %c0_10] : memref<1x256xf32, #tpu.memory_space<vmem>>, vector<1x256xf32>
    %34 = vector.broadcast %33 : vector<1x256xf32> to vector<32x256xf32>
    %35 = arith.addf %32, %34 : vector<32x256xf32>
    %cst_11 = arith.constant 0.000000e+00 : f32
    %36 = vector.broadcast %cst_11 : f32 to vector<32x256xf32>
    %37 = arith.maximumf %35, %36 : vector<32x256xf32>
    %38 = arith.truncf %37 : vector<32x256xf32> to vector<32x256xbf16>
    %39 = vector.extract_strided_slice %38 {offsets = [0, 0], sizes = [8, 256], strides = [1, 1]} : vector<32x256xbf16> to vector<8x256xbf16>
    %40 = vector.extract_strided_slice %38 {offsets = [8, 0], sizes = [8, 256], strides = [1, 1]} : vector<32x256xbf16> to vector<8x256xbf16>
    %41 = vector.extract_strided_slice %38 {offsets = [16, 0], sizes = [8, 256], strides = [1, 1]} : vector<32x256xbf16> to vector<8x256xbf16>
    %42 = vector.extract_strided_slice %38 {offsets = [24, 0], sizes = [8, 256], strides = [1, 1]} : vector<32x256xbf16> to vector<8x256xbf16>
    %43 = tpu.concatenate %39, %40, %41, %42 in 1 : vector<8x256xbf16>, vector<8x256xbf16>, vector<8x256xbf16>, vector<8x256xbf16> -> vector<8x1024xbf16>
    %c0_12 = arith.constant 0 : index
    %c0_13 = arith.constant 0 : index
    %44 = vector.load %arg6[%c0_12, %c0_13] : memref<1024x384xbf16, #tpu.memory_space<vmem>>, vector<1024x384xbf16>
    %cst_14 = arith.constant dense<0.000000e+00> : vector<8x384xf32>
    %45 = tpu.matmul %43, %44, %cst_14 {dimension_numbers = #tpu.dot_dimension_numbers<[1], [0], [0], [1], [0, 0, 1, 1], [], []>} : vector<8x1024xbf16>, vector<1024x384xbf16>, vector<8x384xf32> -> vector<8x384xf32>
    %c0_15 = arith.constant 0 : index
    %c0_16 = arith.constant 0 : index
    %46 = vector.load %arg7[%c0_15, %c0_16] : memref<1x384xf32, #tpu.memory_space<vmem>>, vector<1x384xf32>
    %47 = vector.broadcast %46 : vector<1x384xf32> to vector<8x384xf32>
    %48 = arith.addf %45, %47 : vector<8x384xf32>
    %cst_17 = arith.constant 0.000000e+00 : f32
    %49 = vector.broadcast %cst_17 : f32 to vector<8x384xf32>
    %50 = arith.maximumf %48, %49 : vector<8x384xf32>
    %51 = arith.truncf %50 : vector<8x384xf32> to vector<8x384xbf16>
    %c0_18 = arith.constant 0 : index
    %c0_19 = arith.constant 0 : index
    %52 = vector.load %arg8[%c0_18, %c0_19] : memref<384x512xbf16, #tpu.memory_space<vmem>>, vector<384x512xbf16>
    %cst_20 = arith.constant dense<0.000000e+00> : vector<8x512xf32>
    %53 = tpu.matmul %51, %52, %cst_20 {dimension_numbers = #tpu.dot_dimension_numbers<[1], [0], [0], [1], [0, 0, 1, 1], [], []>} : vector<8x384xbf16>, vector<384x512xbf16>, vector<8x512xf32> -> vector<8x512xf32>
    %c0_21 = arith.constant 0 : index
    %c0_22 = arith.constant 0 : index
    %54 = vector.load %arg9[%c0_21, %c0_22] : memref<1x512xf32, #tpu.memory_space<vmem>>, vector<1x512xf32>
    %55 = vector.broadcast %54 : vector<1x512xf32> to vector<8x512xf32>
    %56 = arith.addf %53, %55 : vector<8x512xf32>
    %cst_23 = arith.constant 0.000000e+00 : f32
    %57 = vector.broadcast %cst_23 : f32 to vector<8x512xf32>
    %58 = arith.maximumf %56, %57 : vector<8x512xf32>
    %59 = arith.truncf %58 : vector<8x512xf32> to vector<8x512xbf16>
    %c0_24 = arith.constant 0 : index
    %c0_25 = arith.constant 0 : index
    %60 = vector.load %arg10[%c0_24, %c0_25] : memref<512x128xbf16, #tpu.memory_space<vmem>>, vector<512x128xbf16>
    %cst_26 = arith.constant dense<0.000000e+00> : vector<8x128xf32>
    %61 = tpu.matmul %59, %60, %cst_26 {dimension_numbers = #tpu.dot_dimension_numbers<[1], [0], [0], [1], [0, 0, 1, 1], [], []>} : vector<8x512xbf16>, vector<512x128xbf16>, vector<8x128xf32> -> vector<8x128xf32>
    %c0_27 = arith.constant 0 : index
    %c0_28 = arith.constant 0 : index
    %62 = vector.load %arg11[%c0_27, %c0_28] : memref<1x128xf32, #tpu.memory_space<vmem>>, vector<1x128xf32>
    %63 = vector.broadcast %62 : vector<1x128xf32> to vector<8x128xf32>
    %64 = arith.addf %61, %63 : vector<8x128xf32>
    %cst_29 = arith.constant dense<0xFF800000> : vector<8xf32>
    %65 = vector.multi_reduction <maximumf>, %64, %cst_29 [1] : vector<8x128xf32> to vector<8xf32>
    %66 = vector.shape_cast %65 : vector<8xf32> to vector<8x1xf32>
    %67 = vector.broadcast %66 : vector<8x1xf32> to vector<8x128xf32>
    %68 = arith.subf %64, %67 : vector<8x128xf32>
    %69 = math.exp %68 : vector<8x128xf32>
    %cst_30 = arith.constant dense<0.000000e+00> : vector<8xf32>
    %70 = vector.multi_reduction <add>, %69, %cst_30 [1] : vector<8x128xf32> to vector<8xf32>
    %71 = vector.shape_cast %70 : vector<8xf32> to vector<8x1xf32>
    %72 = vector.broadcast %71 : vector<8x1xf32> to vector<8x128xf32>
    %73 = arith.divf %69, %72 : vector<8x128xf32>
    %c0_31 = arith.constant 0 : index
    %c0_32 = arith.constant 0 : index
    %74 = vector.load %arg12[%c0_31, %c0_32] : memref<8x128xf32, #tpu.memory_space<vmem>>, vector<8x128xf32>
    tpu.vector_store %arg12[%c0_31, %c0_32], %73 {strides = array<i32>} : memref<8x128xf32, #tpu.memory_space<vmem>>, vector<8x128xf32>,
    return
  }
  func.func @transform_0(%arg0: i32) -> (i32, i32) {
    %c0_i32 = arith.constant 0 : i32
    %c0_i32_0 = arith.constant 0 : i32
    return %arg0, %c0_i32 : i32, i32
  }
  func.func @transform_1(%arg0: i32) -> (i32, i32) {
    %c0_i32 = arith.constant 0 : i32
    %c0_i32_0 = arith.constant 0 : i32
    %c0_i32_1 = arith.constant 0 : i32
    return %c0_i32, %c0_i32_0 : i32, i32
  }
  func.func @transform_2(%arg0: i32) -> (i32, i32) {
    %c0_i32 = arith.constant 0 : i32
    %c0_i32_0 = arith.constant 0 : i32
    %c0_i32_1 = arith.constant 0 : i32
    return %c0_i32, %c0_i32_0 : i32, i32
  }
  func.func @transform_3(%arg0: i32) -> (i32, i32) {
    %c0_i32 = arith.constant 0 : i32
    %c0_i32_0 = arith.constant 0 : i32
    %c0_i32_1 = arith.constant 0 : i32
    return %c0_i32, %c0_i32_0 : i32, i32
  }
  func.func @transform_4(%arg0: i32) -> (i32, i32) {
    %c0_i32 = arith.constant 0 : i32
    %c0_i32_0 = arith.constant 0 : i32
    %c0_i32_1 = arith.constant 0 : i32
    return %c0_i32, %c0_i32_0 : i32, i32
  }
  func.func @transform_5(%arg0: i32) -> (i32, i32) {
    %c0_i32 = arith.constant 0 : i32
    %c0_i32_0 = arith.constant 0 : i32
    %c0_i32_1 = arith.constant 0 : i32
    return %c0_i32, %c0_i32_0 : i32, i32
  }
  func.func @transform_6(%arg0: i32) -> (i32, i32) {
    %c0_i32 = arith.constant 0 : i32
    %c0_i32_0 = arith.constant 0 : i32
    %c0_i32_1 = arith.constant 0 : i32
    return %c0_i32, %c0_i32_0 : i32, i32
  }
  func.func @transform_7(%arg0: i32) -> (i32, i32) {
    %c0_i32 = arith.constant 0 : i32
    %c0_i32_0 = arith.constant 0 : i32
    %c0_i32_1 = arith.constant 0 : i32
    return %c0_i32, %c0_i32_0 : i32, i32
  }
  func.func @transform_8(%arg0: i32) -> (i32, i32) {
    %c0_i32 = arith.constant 0 : i32
    %c0_i32_0 = arith.constant 0 : i32
    %c0_i32_1 = arith.constant 0 : i32
    return %c0_i32, %c0_i32_0 : i32, i32
  }
  func.func @transform_9(%arg0: i32) -> (i32, i32) {
    %c0_i32 = arith.constant 0 : i32
    %c0_i32_0 = arith.constant 0 : i32
    %c0_i32_1 = arith.constant 0 : i32
    return %c0_i32, %c0_i32_0 : i32, i32
  }
  func.func @transform_10(%arg0: i32) -> (i32, i32) {
    %c0_i32 = arith.constant 0 : i32
    %c0_i32_0 = arith.constant 0 : i32
    %c0_i32_1 = arith.constant 0 : i32
    return %c0_i32, %c0_i32_0 : i32, i32
  }
  func.func @transform_11(%arg0: i32) -> (i32, i32) {
    %c0_i32 = arith.constant 0 : i32
    %c0_i32_0 = arith.constant 0 : i32
    return %arg0, %c0_i32 : i32, i32
  }
}

</mosaic_0001>

<bundles_post_ra>
// kernel: actor_forward.1
= control target key start
LH: loop header
LB: loop body
LE: loop exit
PB: predicated region body
PF: predicated region fallthrough
CT: control target
= control target key end

     0   :  { %16 = vsyncpa [#allocation3], 0  ;;  %s5461_s0 = inlined_call_operand.vmem [shape: f32[8,64], index: 0, kind: input, shape index: {}]   ;;  %s5462_s1 = inlined_call_operand.hbm [shape: bf16[64,1152], index: 1, kind: input, shape index: {}]   ;;  %s5463_s2 = inlined_call_operand.vmem [shape: f32[1,1152], index: 2, kind: input, shape index: {}]   ;;  %s5464_s3 = inlined_call_operand.hbm [shape: bf16[512,256], index: 3, kind: input, shape index: {}]   ;;  %s5465_s4 = inlined_call_operand.vmem [shape: f32[1,256], index: 4, kind: input, shape index: {}]   ;;  %s5466_s5 = inlined_call_operand.hbm [shape: bf16[1024,384], index: 5, kind: input, shape index: {}]   ;;  %s5467_s6 = inlined_call_operand.vmem [shape: f32[1,384], index: 6, kind: input, shape index: {}]   ;;  %s5468_s7 = inlined_call_operand.hbm [shape: bf16[384,512], index: 7, kind: input, shape index: {}]   ;;  %s5469_s8 = inlined_call_operand.vmem [shape: f32[1,512], index: 8, kind: input, shape index: {}]   ;;  %s5470_s9 = inlined_call_operand.hbm [shape: bf16[512,128], index: 9, kind: input, shape index: {}]   ;;  %s5471_s10 = inlined_call_operand.vmem [shape: f32[1,128], index: 10, kind: input, shape index: {}]   ;;  %s5472_s11 = inlined_call_operand.vmem [shape: f32[8,128], index: 11, kind: output, shape index: {}]  }
   0x1   :  { %17 = vsyncpa [#allocation5], 0 }
   0x2   :  { %18 = vsyncpa [#allocation8], 0  ;;  %s5212_s17 = smov [#allocation4]  }
   0x3   :  { %s40_s18 = sshll.u32 %s5212_s17, 4  ;;  %s41_s18 = int_to_ptr.vmem [resolvable:$true] %s40_s18 }
   0x4   :  { %s5114_s19 = scalar_lea.vmem %s41_s18, 8192  ;;  %p5119_p1 = scmp.lt.s32.totalorder %s41_s18, %s41_s18 }
   0x5   :  { %p5115_p0 = scmp.ne.s32.totalorder %s41_s18, %s5114_s19  ;;  %p5120_p2 = scmp.lt.s32.totalorder %s5114_s19, %s5114_s19 }
   0x7   :  { %p5121_p3 = por %p5120_p2, %p5119_p1 }
   0x9   :  { %p5122_p4 = pnand %p5121_p3, %p5115_p0 }
   0xb   :  { %5125 = shalt.err (!%p5122_p4)
}
   0xc   :  { %s5213_s20 = smov 128   ;;  %s5214_s21 = smov 8  }
   0xd   :  { %46 = dma.hbm_to_vmem [thread:$0]  %s5464_s3, 8192, %s41_s18, [#allocation5], %s5213_s20, %s5213_s20, %s5214_s21  }
   0xe   :  { %s5215_s24 = smov [#allocation7]  }
   0xf   :  { %s68_s25 = sshll.u32 %s5215_s24, 4  ;;  %s69_s25 = int_to_ptr.vmem [resolvable:$true] %s68_s25 }
  0x10   :  { %s5134_s26 = scalar_lea.vmem %s69_s25, 12288  ;;  %p5139_p6 = scmp.lt.s32.totalorder %s69_s25, %s69_s25 }
  0x11   :  { %p5135_p5 = scmp.ne.s32.totalorder %s69_s25, %s5134_s26  ;;  %p5140_p7 = scmp.lt.s32.totalorder %s5134_s26, %s5134_s26 }
  0x13   :  { %p5141_p8 = por %p5140_p7, %p5139_p6 }
  0x15   :  { %p5142_p9 = pnand %p5141_p8, %p5135_p5 }
  0x17   :  { %5145 = shalt.err (!%p5142_p9)
}
  0x18   :  { %s5216_s27 = smov 256   ;;  %s5217_s28 = smov 16  }
  0x19   :  { %74 = dma.hbm_to_vmem [thread:$0]  %s5468_s7, 12288, %s69_s25, [#allocation8], %s5216_s27, %s5216_s27, %s5217_s28  }
  0x1a   :  { %s5218_s12 = smov [#allocation2]  }
  0x1b   :  { %s26_s13 = sshll.u32 %s5218_s12, 4  ;;  %s27_s13 = int_to_ptr.vmem [resolvable:$true] %s26_s13 }
  0x1c   :  { %s5154_s3 = scalar_lea.vmem %s27_s13, 4608  ;;  %p5159_p11 = scmp.lt.s32.totalorder %s27_s13, %s27_s13 }
  0x1d   :  { %p5155_p10 = scmp.ne.s32.totalorder %s27_s13, %s5154_s3  ;;  %p5160_p12 = scmp.lt.s32.totalorder %s5154_s3, %s5154_s3 }
  0x1f   :  { %p5161_p13 = por %p5160_p12, %p5159_p11 }
  0x21   :  { %p5162_p0 = pnand %p5161_p13, %p5155_p10 }
  0x23   :  { %5165 = shalt.err (!%p5162_p0)
}
  0x24   :  { %s5219_s14 = smov 576   ;;  %s5220_s15 = smov 36  }
  0x25   :  { %32 = dma.hbm_to_vmem [thread:$0]  %s5462_s1, 4608, %s27_s13, [#allocation3], %s5219_s14, %s5219_s14, %s5220_s15  }
  0x26   :  { %s5221_s18 = smov [#allocation6]  }
  0x27   :  { %s54_s19 = sshll.u32 %s5221_s18, 4  ;;  %s55_s19 = int_to_ptr.vmem [resolvable:$true] %s54_s19 }
  0x28   :  { %s5174_s7 = scalar_lea.vmem %s55_s19, 24576  ;;  %p5179_p2 = scmp.lt.s32.totalorder %s55_s19, %s55_s19 }
  0x29   :  { %p5175_p1 = scmp.ne.s32.totalorder %s55_s19, %s5174_s7  ;;  %p5180_p3 = scmp.lt.s32.totalorder %s5174_s7, %s5174_s7 }
  0x2b   :  { %p5181_p4 = por %p5180_p3, %p5179_p2 }
  0x2d   :  { %p5182_p5 = pnand %p5181_p4, %p5175_p1 }
  0x2f   :  { %5185 = shalt.err (!%p5182_p5)
}
  0x30   :  { %s5222_s20 = smov 192   ;;  %s5223_s21 = smov 12  }
  0x31   :  { %60 = dma.hbm_to_vmem [thread:$0]  %s5466_s5, 24576, %s55_s19, [#allocation5], %s5222_s20, %s5222_s20, %s5223_s21  }
  0x32   :  { %s5224_s24 = smov [#allocation9]  }
  0x33   :  { %s82_s25 = sshll.u32 %s5224_s24, 4  ;;  %s83_s25 = int_to_ptr.vmem [resolvable:$true] %s82_s25 }
  0x34   :  { %s5194_s1 = scalar_lea.vmem %s83_s25, 4096  ;;  %p5199_p7 = scmp.lt.s32.totalorder %s83_s25, %s83_s25 }
  0x35   :  { %p5195_p6 = scmp.ne.s32.totalorder %s83_s25, %s5194_s1  ;;  %p5200_p8 = scmp.lt.s32.totalorder %s5194_s1, %s5194_s1 }
  0x37   :  { %p5201_p9 = por %p5200_p8, %p5199_p7 }
  0x39   :  { %p5202_p10 = pnand %p5201_p9, %p5195_p6 }
  0x3b   :  { %5205 = shalt.err (!%p5202_p10)
}
  0x3c   :  { %s5225_s26 = smov 64   ;;  %s5226_s27 = smov 4  }
  0x3d   :  { %88 = dma.hbm_to_vmem [thread:$0]  %s5470_s9, 4096, %s83_s25, [#allocation8], %s5225_s26, %s5225_s26, %s5226_s27  }
  0x3e   :  { %5206 = dma.done.wait [#allocation3], 4608  }
  0x3f   :  { %5207 = vsyncadd [#allocation3], 4294962688 }
  0x40   :  { %5208 = dma.done.wait [#allocation5], 32768  }
  0x41   :  { %5209 = vsyncadd [#allocation5], 4294934528 }
  0x42   :  { %5210 = dma.done.wait [#allocation8], 16384  }
  0x43   :  { %5211 = vsyncadd [#allocation8], 4294950912  ;;  %v5227_v0 = vmov 0   ;;  %v4522_v1 = vld [vmem:[#allocation2 + $0xdc] ss:$36 sps:$4 sm:$0xff]   ;;  %vm382_vm0 = vcmask 523264  }
  0x44   :  { %418 = vmatprep.mubr.bf16.mxu0 %v5227_v0  ;;  %459 = vmatprep.mubr.bf16.mxu1 %v5227_v0  ;;  %v4524_v2 = vld [vmem:[#allocation2 + $0xe4] ss:$36 sps:$4 sm:$0xff]   ;;  %v4526_v3 = vld [vmem:[#allocation2 + $0xd8] ss:$36 sps:$4 sm:$0xff]   ;;  %v4532_v7 = vld [vmem:[#allocation2 + $0x90] ss:$36 sps:$4 sm:$0xff]  }
  0x45   :  { %394 = vmatprep.subr.bf16.mxu0 %v4522_v1  ;;  %v4527_v4 = vld [vmem:[#allocation2 + $0xe0] ss:$36 sps:$4 sm:$0xff]   ;;  %435 = vmatprep.subr.bf16.mxu1 %v4524_v2  ;;  %v4528_v5 = vld [vmem:[#allocation2 + $0x94] ss:$36 sps:$4 sm:$0xff]   ;;  %v4534_v9 = vld [vmem:[#allocation2 + $0x4c] ss:$36 sps:$4 sm:$0xff]  }
  0x46   :  { %395 = vmatpush1.bf16.msra.mxu0 %v4526_v3  ;;  %436 = vmatpush1.bf16.msra.mxu1 %v4527_v4  ;;  %v4530_v6 = vld [vmem:[#allocation2 + $0x9c] ss:$36 sps:$4 sm:$0xff]   ;;  %v4536_v10 = vld [vmem:[#allocation2 + $0x54] ss:$36 sps:$4 sm:$0xff]   ;;  %v4538_v11 = vld [vmem:[#allocation2 + $0x48] ss:$36 sps:$4 sm:$0xff]  }
  0x47   :  { %396 = vmatprep.subr.bf16.mxu0 %v4528_v5  ;;  %v4533_v8 = vld [vmem:[#allocation2 + $0x98] ss:$36 sps:$4 sm:$0xff]   ;;  %437 = vmatprep.subr.bf16.mxu1 %v4530_v6  ;;  %v4539_v12 = vld [vmem:[#allocation2 + $0x50] ss:$36 sps:$4 sm:$0xff]   ;;  %v4540_v13 = vld [vmem:[#allocation2 + $0x4] ss:$36 sps:$4 sm:$0xff]  }
  0x48   :  { %v4542_v14 = vld [vmem:[#allocation2 + $0xc] ss:$36 sps:$4 sm:$0xff]   ;;  %v4544_v15 = vld [vmem:[#allocation2] ss:$36 sps:$4 sm:$0xff]   ;;  %v4560_v22 = vld [vmem:[#allocation2 + $0xf4] ss:$36 sps:$4 sm:$0xff]  }
  0x49   :  { %v4545_v16 = vld [vmem:[#allocation2 + $0x8] ss:$36 sps:$4 sm:$0xff]   ;;  %v107_v17 = vld [vmem:[%s5461_s0] sm:$0xff]  ;;  %v4558_v23 = vld [vmem:[#allocation2 + $0xf0] ss:$36 sps:$4 sm:$0xff]   ;;  %v5228_v37 = vmov 0.0  }
  0x4a   :  { %397 = vmatpush1.bf16.msra.mxu0 %v4532_v7  ;;  %438 = vmatpush1.bf16.msra.mxu1 %v4533_v8  ;;  %v4548_v18 = vld [vmem:[#allocation2 + $0xec] ss:$36 sps:$4 sm:$0xff]   ;;  %v5310_v19 = vpack.c.bf16 %v107_v17, %v107_v17  ;;  %v4551_v21 = vld [vmem:[#allocation2 + $0xa4] ss:$36 sps:$4 sm:$0xff]   ;;  %v4554_v26 = vld [vmem:[#allocation2 + $0x5c] ss:$36 sps:$4 sm:$0xff]  }
  0x4b   :  { %398 = vmatprep.subr.bf16.mxu0 %v4534_v9  ;;  %439 = vmatprep.subr.bf16.mxu1 %v4536_v10  ;;  %v4546_v20 = vld [vmem:[#allocation2 + $0xe8] ss:$36 sps:$4 sm:$0xff]   ;;  %v4549_v25 = vld [vmem:[#allocation2 + $0xa0] ss:$36 sps:$4 sm:$0xff]   ;;  %v4552_v29 = vld [vmem:[#allocation2 + $0x58] ss:$36 sps:$4 sm:$0xff]  }
  0x4c   :  { %v4564_v24 = vld [vmem:[#allocation2 + $0xac] ss:$36 sps:$4 sm:$0xff]   ;;  %v4568_v28 = vld [vmem:[#allocation2 + $0x64] ss:$36 sps:$4 sm:$0xff]   ;;  %v4557_v30 = vld [vmem:[#allocation2 + $0x14] ss:$36 sps:$4 sm:$0xff]  }
  0x4d   :  { %v4562_v27 = vld [vmem:[#allocation2 + $0xa8] ss:$36 sps:$4 sm:$0xff]   ;;  %v4566_v31 = vld [vmem:[#allocation2 + $0x60] ss:$36 sps:$4 sm:$0xff]   ;;  %v4555_v33 = vld [vmem:[#allocation2 + $0x10] ss:$36 sps:$4 sm:$0xff]  }
  0x4e   :  { %399 = vmatpush1.bf16.msra.mxu0 %v4538_v11  ;;  %440 = vmatpush1.bf16.msra.mxu1 %v4539_v12  ;;  %v4572_v32 = vld [vmem:[#allocation2 + $0x1c] ss:$36 sps:$4 sm:$0xff]   ;;  %v4574_v38 = vld [vmem:[#allocation4 + $0x70] ss:$8 sps:$4 sm:$0xff]   ;;  %v4579_v39 = vld [vmem:[#allocation4 + $0x64] ss:$8 sps:$4 sm:$0xff]  }
  0x4f   :  { %400 = vmatprep.subr.bf16.mxu0 %v4540_v13  ;;  %441 = vmatprep.subr.bf16.mxu1 %v4542_v14  ;;  %v4570_v34 = vld [vmem:[#allocation2 + $0x18] ss:$36 sps:$4 sm:$0xff]   ;;  %v4565_v40 = vld [vmem:[#allocation2 + $0xb0] ss:$36 sps:$4 sm:$0xff]   ;;  %vm5229_vm1 = vmmov 0   ;;  %vm620_vm2 = vcmask 1043456  }
  0x50   :  { %v4576_v35 = vld [vmem:[#allocation4 + $0x74] ss:$8 sps:$4 sm:$0xff]   ;;  %v4577_v41 = vld [vmem:[#allocation4 + $0x60] ss:$8 sps:$4 sm:$0xff]   ;;  %v4580_v44 = vld [vmem:[#allocation4 + $0x50] ss:$8 sps:$4 sm:$0xff]  }
  0x51   :  { %v4561_v36 = vld [vmem:[#allocation2 + $0xf8] ss:$36 sps:$4 sm:$0xff]   ;;  %v4569_v43 = vld [vmem:[#allocation2 + $0x68] ss:$36 sps:$4 sm:$0xff]   ;;  %v4573_v46 = vld [vmem:[#allocation2 + $0x20] ss:$36 sps:$4 sm:$0xff]  }
  0x52   :  { %401 = vmatpush1.bf16.msra.mxu0 %v4544_v15  ;;  %442 = vmatpush1.bf16.msra.mxu1 %v4545_v16  ;;  %v4582_v42 = vld [vmem:[#allocation4 + $0x54] ss:$8 sps:$4 sm:$0xff]   ;;  %v4585_v45 = vld [vmem:[#allocation4 + $0x44] ss:$8 sps:$4 sm:$0xff]   ;;  %v4583_v48 = vld [vmem:[#allocation4 + $0x40] ss:$8 sps:$4 sm:$0xff]  }
  0x53   :  { %476 = vmatprep.subr.bf16.mxu0 %v4548_v18  ;;  %517 = vmatprep.subr.bf16.mxu1 %v4560_v22  ;;  %v4591_v47 = vld [vmem:[#allocation4 + $0x174] ss:$8 sps:$4 sm:$0xff]   ;;  %v4589_v50 = vld [vmem:[#allocation4 + $0x170] ss:$8 sps:$4 sm:$0xff]   ;;  %v4597_v51 = vld [vmem:[#allocation4 + $0x164] ss:$8 sps:$4 sm:$0xff]  }
  0x54   :  { %v4588_v49 = vld [vmem:[#allocation4 + $0x34] ss:$8 sps:$4 sm:$0xff]   ;;  %v4586_v52 = vld [vmem:[#allocation4 + $0x30] ss:$8 sps:$4 sm:$0xff]   ;;  %v4594_v53 = vld [vmem:[#allocation4 + $0x24] ss:$8 sps:$4 sm:$0xff]  }
  0x55   :  { %3965 = vmatmul.mubr.msk.bf16.vlgmr.msra.gmra.mxu0 %vm382_vm0, %v5310_v19  ;;  %3966 = vmatmul.mubr.msk.bf16.vlgmr.msra.gmra.mxu1 %vm382_vm0, %v5310_v19  ;;  %v4595_v54 = vld [vmem:[#allocation4 + $0x160] ss:$8 sps:$4 sm:$0xff]   ;;  %v4603_v56 = vld [vmem:[#allocation4 + $0x154] ss:$8 sps:$4 sm:$0xff]   ;;  %v4601_v58 = vld [vmem:[#allocation4 + $0x150] ss:$8 sps:$4 sm:$0xff]  }
  0x56   :  { %477 = vmatpush1.bf16.msra.mxu0 %v4546_v20  ;;  %500 = vmatprep.mubr.bf16.mxu0 %v5227_v0  ;;  %v4592_v55 = vld [vmem:[#allocation4 + $0x20] ss:$8 sps:$4 sm:$0xff]   ;;  %v4600_v57 = vld [vmem:[#allocation4 + $0x14] ss:$8 sps:$4 sm:$0xff]   ;;  %v4609_v59 = vld [vmem:[#allocation4 + $0x144] ss:$8 sps:$4 sm:$0xff]  }
  0x57   :  { %478 = vmatprep.subr.bf16.mxu0 %v4551_v21  ;;  %518 = vmatpush1.bf16.msra.mxu1 %v4558_v23  ;;  %v4598_v60 = vld [vmem:[#allocation4 + $0x10] ss:$8 sps:$4 sm:$0xff]   ;;  %v4606_v61 = vld [vmem:[#allocation4 + $0x4] ss:$8 sps:$4 sm:$0xff]   ;;  %v4607_v62 = vld [vmem:[#allocation4 + $0x140] ss:$8 sps:$4 sm:$0xff]  }
  0x58   :  { %541 = vmatprep.mubr.bf16.mxu1 %v5227_v0  ;;  %519 = vmatprep.subr.bf16.mxu1 %v4564_v24  ;;  %v4615_v63 = vld [vmem:[#allocation4 + $0x134] ss:$8 sps:$4 sm:$0xff]   ;;  %v4604_v1 = vld [vmem:[#allocation4] ss:$8 sps:$4 sm:$0xff]   ;;  %v4613_v3 = vld [vmem:[#allocation4 + $0x130] ss:$8 sps:$4 sm:$0xff]  }
  0x59   :  { %v4612_v2 = vld [vmem:[#allocation4 + $0xf4] ss:$8 sps:$4 sm:$0xff]   ;;  %v4621_v4 = vld [vmem:[#allocation4 + $0x124] ss:$8 sps:$4 sm:$0xff]   ;;  %v4610_v5 = vld [vmem:[#allocation4 + $0xf0] ss:$8 sps:$4 sm:$0xff]  }
  0x5a   :  { %479 = vmatpush1.bf16.msra.mxu0 %v4549_v25  ;;  %v4618_v6 = vld [vmem:[#allocation4 + $0xe4] ss:$8 sps:$4 sm:$0xff]   ;;  %v4619_v7 = vld [vmem:[#allocation4 + $0x120] ss:$8 sps:$4 sm:$0xff]   ;;  %v4627_v8 = vld [vmem:[#allocation4 + $0x114] ss:$8 sps:$4 sm:$0xff]  }
  0x5b   :  { %480 = vmatprep.subr.bf16.mxu0 %v4554_v26  ;;  %520 = vmatpush1.bf16.msra.mxu1 %v4562_v27  ;;  %v4616_v9 = vld [vmem:[#allocation4 + $0xe0] ss:$8 sps:$4 sm:$0xff]   ;;  %v4624_v10 = vld [vmem:[#allocation4 + $0xd4] ss:$8 sps:$4 sm:$0xff]   ;;  %v4625_v11 = vld [vmem:[#allocation4 + $0x110] ss:$8 sps:$4 sm:$0xff]  }
  0x5c   :  { %521 = vmatprep.subr.bf16.mxu1 %v4568_v28  ;;  %v4633_v12 = vld [vmem:[#allocation4 + $0x104] ss:$8 sps:$4 sm:$0xff]   ;;  %v4622_v13 = vld [vmem:[#allocation4 + $0xd0] ss:$8 sps:$4 sm:$0xff]   ;;  %v4631_v15 = vld [vmem:[#allocation4 + $0x100] ss:$8 sps:$4 sm:$0xff]  }
  0x5d   :  { %v4630_v14 = vld [vmem:[#allocation4 + $0xc4] ss:$8 sps:$4 sm:$0xff]   ;;  %v4639_v16 = vld [vmem:[#allocation4 + $0x1f4] ss:$8 sps:$4 sm:$0xff]   ;;  %v4628_v17 = vld [vmem:[#allocation4 + $0xc0] ss:$8 sps:$4 sm:$0xff]  }
  0x5e   :  { %481 = vmatpush1.bf16.msra.mxu0 %v4552_v29  ;;  %v4636_v18 = vld [vmem:[#allocation4 + $0xb4] ss:$8 sps:$4 sm:$0xff]   ;;  %v4634_v20 = vld [vmem:[#allocation4 + $0xb0] ss:$8 sps:$4 sm:$0xff]   ;;  %v4642_v21 = vld [vmem:[#allocation4 + $0xa4] ss:$8 sps:$4 sm:$0xff]  }
  0x5f   :  { %482 = vmatprep.subr.bf16.mxu0 %v4557_v30  ;;  %522 = vmatpush1.bf16.msra.mxu1 %v4566_v31  ;;  %v4645_v22 = vld [vmem:[#allocation4 + $0x1e4] ss:$8 sps:$4 sm:$0xff]   ;;  %v4643_v23 = vld [vmem:[#allocation4 + $0x1e0] ss:$8 sps:$4 sm:$0xff]   ;;  %v4648_v25 = vld [vmem:[#allocation4 + $0x94] ss:$8 sps:$4 sm:$0xff]  }
  0x60   :  { %523 = vmatprep.subr.bf16.mxu1 %v4572_v32  ;;  %v4640_v24 = vld [vmem:[#allocation4 + $0xa0] ss:$8 sps:$4 sm:$0xff]   ;;  %v4651_v26 = vld [vmem:[#allocation4 + $0x1d4] ss:$8 sps:$4 sm:$0xff]   ;;  %v4649_v27 = vld [vmem:[#allocation4 + $0x1d0] ss:$8 sps:$4 sm:$0xff]  }
  0x61   :  { %v4646_v28 = vld [vmem:[#allocation4 + $0x90] ss:$8 sps:$4 sm:$0xff]   ;;  %v4654_v29 = vld [vmem:[#allocation4 + $0x84] ss:$8 sps:$4 sm:$0xff]   ;;  %v4655_v31 = vld [vmem:[#allocation4 + $0x1c0] ss:$8 sps:$4 sm:$0xff]  }
  0x62   :  { %483 = vmatpush1.bf16.msra.mxu0 %v4555_v33  ;;  %v4657_v30 = vld [vmem:[#allocation4 + $0x1c4] ss:$8 sps:$4 sm:$0xff]   ;;  %v4652_v32 = vld [vmem:[#allocation4 + $0x80] ss:$8 sps:$4 sm:$0xff]   ;;  %v4660_v33 = vld [vmem:[#allocation4 + $0x1b4] ss:$8 sps:$4 sm:$0xff]  }
  0x63   :  { %4492 = vmatprep.subr.bf16.mxu0 %v5228_v37  ;;  %524 = vmatpush1.bf16.msra.mxu1 %v4570_v34  ;;  %v4658_v34 = vld [vmem:[#allocation4 + $0x1b0] ss:$8 sps:$4 sm:$0xff]  }
  0x64   :  { %1041 = vmatprep.subr.bf16.mxu1 %v4576_v35  ;;  %v4663_v35 = vld [vmem:[#allocation4 + $0x1a4] ss:$8 sps:$4 sm:$0xff]  }
  0x65   :  { %3967 = vmatmul.mubr.msk.bf16.vlgmr.msra.gmra.mxu0 %vm382_vm0, %v5310_v19 }
  0x66   :  { %4493 = vmatpush3.bf16.msra.mxu0 %v4561_v36  ;;  %4500 = vmatprep.mubr.msk.bf16.mxu0 %vm5229_vm1, %v5228_v37  ;;  %v4661_v36 = vld [vmem:[#allocation4 + $0x1a0] ss:$8 sps:$4 sm:$0xff]  }
  0x67   :  { %4494 = vmatprep.subr.bf16.mxu0 %v5228_v37  ;;  %3968 = vmatmul.mubr.msk.bf16.vlgmr.msra.gmra.mxu1 %vm382_vm0, %v5310_v19 }
  0x68   :  { %1042 = vmatpush1.bf16.msra.mxu1 %v4574_v38  ;;  %v4664_v38 = vld [vmem:[#allocation4 + $0x190] ss:$8 sps:$4 sm:$0xff]  }
  0x69   :  { %1043 = vmatprep.subr.bf16.mxu1 %v4579_v39  ;;  %v4669_v39 = vld [vmem:[#allocation4 + $0x184] ss:$8 sps:$4 sm:$0xff]  }
  0x6a   :  { %4495 = vmatpush3.bf16.msra.mxu0 %v4565_v40  ;;  %v4667_v40 = vld [vmem:[#allocation4 + $0x180] ss:$8 sps:$4 sm:$0xff]  }
  0x6b   :  { %4496 = vmatprep.subr.bf16.mxu0 %v5228_v37 }
  0x6c   :  { %1044 = vmatpush1.bf16.msra.mxu1 %v4577_v41  ;;  %v4672_v41 = vld [vmem:[#allocation6 + $0xac] ss:$12 sps:$4 sm:$0xff]  }
  0x6d   :  { %1045 = vmatprep.subr.bf16.mxu1 %v4582_v42  ;;  %v4675_v42 = vld [vmem:[#allocation6 + $0x22c] ss:$12 sps:$4 sm:$0xff]  }
  0x6e   :  { %4497 = vmatpush3.bf16.msra.mxu0 %v4569_v43  ;;  %v153_v43 = vlaneseq }
  0x6f   :  { %4498 = vmatprep.subr.bf16.mxu0 %v5228_v37  ;;  %v4666_v37 = vld [vmem:[#allocation4 + $0x194] ss:$8 sps:$4 sm:$0xff]  }
  0x70   :  { %1046 = vmatpush1.bf16.msra.mxu1 %v4580_v44  ;;  %v5324_v44 = vshrl.u32 %v153_v43, 7 }
  0x71   :  { %1047 = vmatprep.subr.bf16.mxu1 %v4585_v45 }
  0x72   :  { %4499 = vmatpush3.bf16.msra.mxu0 %v4573_v46  ;;  %v5327_v45 = vsub.s32 0, %v5324_v44  ;;  %v5330_v46 = vsub.s32 2, %v5324_v44 }
  0x73   :  { %1094 = vmatprep.subr.bf16.mxu0 %v4591_v47  ;;  %v5333_v47 = vsub.s32 1, %v5324_v44 }
  0x74   :  { %1048 = vmatpush1.bf16.msra.mxu1 %v4583_v48  ;;  %v5338_v48 = vld [vmem:[%s5463_s2] sm:$0xff] }
  0x75   :  { %4501 = vmatmul.mubr.msk.bf16.vlgmr.msra.gmra.mxu0 %vm382_vm0, %v5310_v19  ;;  %1049 = vmatprep.subr.bf16.mxu1 %v4588_v49  ;;  %v4637_v19 = vld [vmem:[#allocation4 + $0x1f0] ss:$8 sps:$4 sm:$0xff]   ;;  %v156_v49 = vrot.slane %v5338_v48, %v5327_v45 }
  0x76   :  { %1095 = vmatpush1.bf16.msra.mxu0 %v4589_v50  ;;  %v164_v50 = vrot.slane %v5338_v48, %v5330_v46 }
  0x77   :  { %1096 = vmatprep.subr.bf16.mxu0 %v4597_v51  ;;  %v160_v51 = vrot.slane %v5338_v48, %v5333_v47 }
  0x78   :  { %1050 = vmatpush1.bf16.msra.mxu1 %v4586_v52 }
  0x79   :  { %1051 = vmatprep.subr.bf16.mxu1 %v4594_v53 }
  0x7a   :  { %1097 = vmatpush1.bf16.msra.mxu0 %v4595_v54 }
  0x7b   :  { %1098 = vmatprep.subr.bf16.mxu0 %v4603_v56 }
  0x7c   :  { %1052 = vmatpush1.bf16.msra.mxu1 %v4592_v55 }
  0x7d   :  { %1053 = vmatprep.subr.bf16.mxu1 %v4600_v57 }
  0x7e   :  { %1099 = vmatpush1.bf16.msra.mxu0 %v4601_v58 }
  0x7f   :  { %1100 = vmatprep.subr.bf16.mxu0 %v4609_v59 }
  0x80   :  { %1054 = vmatpush1.bf16.msra.mxu1 %v4598_v60 }
  0x81   :  { %1055 = vmatprep.subr.bf16.mxu1 %v4606_v61 }
  0x82   :  { %1101 = vmatpush1.bf16.msra.mxu0 %v4607_v62 }
  0x83   :  { %1102 = vmatprep.subr.bf16.mxu0 %v4615_v63 }
  0x84   :  { %1056 = vmatpush1.bf16.msra.mxu1 %v4604_v1 }
  0x85   :  { %1057 = vmatprep.subr.bf16.mxu1 %v4612_v2 }
  0x86   :  { %1103 = vmatpush1.bf16.msra.mxu0 %v4613_v3 }
  0x87   :  { %1104 = vmatprep.subr.bf16.mxu0 %v4621_v4 }
  0x88   :  { %1058 = vmatpush2.bf16.msra.mxu1 %v4610_v5 }
  0x89   :  { %1059 = vmatprep.subr.bf16.mxu1 %v4618_v6 }
  0x8a   :  { %1105 = vmatpush1.bf16.msra.mxu0 %v4619_v7 }
  0x8b   :  { %1106 = vmatprep.subr.bf16.mxu0 %v4627_v8 }
  0x8c   :  { %1060 = vmatpush2.bf16.msra.mxu1 %v4616_v9  ;;  %v171_v9 = vsub.s32 4, %v5324_v44 }
  0x8d   :  { %1061 = vmatprep.subr.bf16.mxu1 %v4624_v10  ;;  %v4670_v10 = vld [vmem:[#allocation6 + $0xa8] ss:$12 sps:$4 sm:$0xff]  }
  0x8e   :  { %1107 = vmatpush1.bf16.msra.mxu0 %v4625_v11  ;;  %v167_v11 = vsub.s32 3, %v5324_v44 }
  0x8f   :  { %1108 = vmatprep.subr.bf16.mxu0 %v4633_v12  ;;  %v4678_v12 = vld [vmem:[#allocation6 + $0x94] ss:$12 sps:$4 sm:$0xff]  }
  0x90   :  { %1062 = vmatpush2.bf16.msra.mxu1 %v4622_v13 }
  0x91   :  { %1063 = vmatprep.subr.bf16.mxu1 %v4630_v14  ;;  %v175_v14 = vsub.s32 5, %v5324_v44 }
  0x92   :  { %1109 = vmatpush1.bf16.msra.mxu0 %v4631_v15  ;;  %v172_v15 = vrot.slane %v5338_v48, %v171_v9 }
  0x93   :  { %1110 = vmatprep.subr.bf16.mxu0 %v4639_v16  ;;  %v4676_v16 = vld [vmem:[#allocation6 + $0x90] ss:$12 sps:$4 sm:$0xff]  }
  0x94   :  { %1064 = vmatpush2.bf16.msra.mxu1 %v4628_v17  ;;  %v168_v17 = vrot.slane %v5338_v48, %v167_v11 }
  0x95   :  { %1065 = vmatprep.subr.bf16.mxu1 %v4636_v18  ;;  %v4684_v18 = vld [vmem:[#allocation6 + $0x7c] ss:$12 sps:$4 sm:$0xff]  }
  0x96   :  { %1111 = vmatpush2.bf16.msra.mxu0 %v4637_v19  ;;  %v176_v19 = vrot.slane %v5338_v48, %v175_v14 }
  0x97   :  { %1112 = vmatprep.subr.bf16.mxu0 %v4645_v22 }
  0x98   :  { %1066 = vmatpush2.bf16.msra.mxu1 %v4634_v20 }
  0x99   :  { %1067 = vmatprep.subr.bf16.mxu1 %v4642_v21  ;;  %v183_v21 = vsub.s32 7, %v5324_v44 }
  0x9a   :  { %1113 = vmatpush2.bf16.msra.mxu0 %v4643_v23  ;;  %v4682_v23 = vld [vmem:[#allocation6 + $0x78] ss:$12 sps:$4 sm:$0xff]  }
  0x9b   :  { %1114 = vmatprep.subr.bf16.mxu0 %v4651_v26 }
  0x9c   :  { %1068 = vmatpush2.bf16.msra.mxu1 %v4640_v24 }
  0x9d   :  { %1069 = vmatprep.subr.bf16.mxu1 %v4648_v25 }
  0x9e   :  { %1115 = vmatpush2.bf16.msra.mxu0 %v4649_v27  ;;  %v4690_v27 = vld [vmem:[#allocation6 + $0x64] ss:$12 sps:$4 sm:$0xff]  }
  0x9f   :  { %1116 = vmatprep.subr.bf16.mxu0 %v4657_v30 }
  0xa0   :  { %1070 = vmatpush2.bf16.msra.mxu1 %v4646_v28 }
  0xa1   :  { %1071 = vmatprep.subr.bf16.mxu1 %v4654_v29 }
  0xa2   :  { %1117 = vmatpush2.bf16.msra.mxu0 %v4655_v31  ;;  %v179_v31 = vsub.s32 6, %v5324_v44 }
  0xa3   :  { %1118 = vmatprep.subr.bf16.mxu0 %v4660_v33 }
  0xa4   :  { %1072 = vmatpush2.bf16.msra.mxu1 %v4652_v32  ;;  %v184_v32 = vrot.slane %v5338_v48, %v183_v21  ;;  %v180_v43 = vrot.slane %v5338_v48, %v179_v31  ;;  %v3928_v48 = vld [vmem:[%s5463_s2 + $0x8] ss:$0 sm:$0xff]  ;;  %v4717_v31 = vld [vmem:[#allocation6 + $0x184] ss:$12 sps:$4 sm:$0xff]  }
  0xa5   :  { %2468 = vmatprep.subr.bf16.mxu1 %v4672_v41 }
  0xa6   :  { %1119 = vmatpush2.bf16.msra.mxu0 %v4658_v34 }
  0xa7   :  { %1120 = vmatprep.subr.bf16.mxu0 %v4663_v35 }
  0xaa   :  { %1121 = vmatpush2.bf16.msra.mxu0 %v4661_v36  ;;  %v4688_v36 = vld [vmem:[#allocation6 + $0x60] ss:$12 sps:$4 sm:$0xff]  }
  0xab   :  { %1122 = vmatprep.subr.bf16.mxu0 %v4666_v37 }
  0xae   :  { %1123 = vmatpush2.bf16.msra.mxu0 %v4664_v38 }
  0xaf   :  { %1124 = vmatprep.subr.bf16.mxu0 %v4669_v39 }
  0xb2   :  { %1125 = vmatpush2.bf16.msra.mxu0 %v4667_v40  ;;  %v4696_v40 = vld [vmem:[#allocation6 + $0x4c] ss:$12 sps:$4 sm:$0xff]  }
  0xb3   :  { %2509 = vmatprep.subr.bf16.mxu0 %v4675_v42 }
 0x115   :  { %v420_v52 = vpop.f32.mrf.mxu0  ;;  %v461_v53 = vpop.f32.mrf.mxu1 }
 0x116   :  { %v421_v54 = vadd.f32 %v420_v52, %v156_v49  ;;  %v462_v55 = vadd.f32 %v461_v53, %v164_v50  ;;  %v4673_v53 = vld [vmem:[#allocation6 + $0x228] ss:$12 sps:$4 sm:$0xff]  }
 0x117   :  { %v422_v56 = vpop.f32.mrf.mxu0  ;;  %v463_v57 = vpop.f32.mrf.mxu1 }
 0x118   :  { %v592_v58 = vmax.f32 %v462_v55, 0.0  ;;  %v423_v59 = vadd.f32 %v422_v56, %v160_v51  ;;  %v590_v62 = vmax.f32 %v421_v54, 0.0  ;;  %v464_v24 = vadd.f32 %v463_v57, %v168_v17  ;;  %v4694_v54 = vld [vmem:[#allocation6 + $0x48] ss:$12 sps:$4 sm:$0xff]  }
 0x119   :  { %v424_v60 = vpop.f32.mrf.mxu0  ;;  %v465_v61 = vpop.f32.mrf.mxu1  ;;  %v4681_v56 = vld [vmem:[#allocation6 + $0x214] ss:$12 sps:$4 sm:$0xff]  }
 0x11a   :  { %v601_v63 = vpack.c.bf16 %v592_v58, %v592_v58  ;;  %v591_v1 = vmax.f32 %v423_v59, 0.0  ;;  %v599_v6 = vpack.c.bf16 %v590_v62, %v590_v62  ;;  %v593_v37 = vmax.f32 %v464_v24, 0.0  ;;  %v4702_v57 = vld [vmem:[#allocation6 + $0x34] ss:$12 sps:$4 sm:$0xff]   ;;  %v4679_v61 = vld [vmem:[#allocation6 + $0x210] ss:$12 sps:$4 sm:$0xff]  }
 0x11b   :  { %v425_v2 = vpop.f32.mrf.mxu0  ;;  %v466_v3 = vpop.f32.mrf.mxu1  ;;  %v4700_v62 = vld [vmem:[#allocation6 + $0x30] ss:$12 sps:$4 sm:$0xff]   ;;  %v4720_v24 = vld [vmem:[#allocation6 + $0x16c] ss:$12 sps:$4 sm:$0xff]  }
 0x11c   :  { %v613_v4 = vrot.slane %v601_v63, 4  ;;  %v600_v5 = vpack.c.bf16 %v591_v1, %v591_v1  ;;  %v602_v52 = vpack.c.bf16 %v593_v37, %v593_v37  ;;  %v4687_v63 = vld [vmem:[#allocation6 + $0x1fc] ss:$12 sps:$4 sm:$0xff]   ;;  %v4729_v37 = vld [vmem:[#allocation6 + $0x2d4] ss:$12 sps:$4 sm:$0xff]  }
 0x11d   :  { %v4708_v1 = vld [vmem:[#allocation6 + $0x1c] ss:$12 sps:$4 sm:$0xff]  }
 0x11e   :  { %v612_v7 = vrot.slane %v600_v5, 4  ;;  %v627_v8 = vsel %vm620_vm2, %v600_v5, %v613_v4 }
 0x11f   :  { %1073 = vmatprep.mubr.bf16.mxu1 %v627_v8  ;;  %v4706_v8 = vld [vmem:[#allocation6 + $0x18] ss:$12 sps:$4 sm:$0xff]  }
 0x120   :  { %v623_v13 = vsel %vm620_vm2, %v599_v6, %v612_v7  ;;  %v4685_v7 = vld [vmem:[#allocation6 + $0x1f8] ss:$12 sps:$4 sm:$0xff]  }
 0x121   :  { %1074 = vmatmul.mubr.bf16.vlgmr.msra.gmra.mxu1 %v623_v13 }
 0x122   :  { %2469 = vmatpush1.bf16.msra.mxu1 %v4670_v10  ;;  %v4693_v10 = vld [vmem:[#allocation6 + $0x1e4] ss:$12 sps:$4 sm:$0xff]  }
 0x123   :  { %2470 = vmatprep.subr.bf16.mxu1 %v4678_v12  ;;  %v4714_v12 = vld [vmem:[#allocation6 + $0x4] ss:$12 sps:$4 sm:$0xff]  }
 0x125   :  { %v502_v20 = vpop.f32.mrf.mxu0 }
 0x126   :  { %v503_v22 = vadd.f32 %v502_v20, %v172_v15  ;;  %2471 = vmatpush1.bf16.msra.mxu1 %v4676_v16  ;;  %v4699_v20 = vld [vmem:[#allocation6 + $0x1cc] ss:$12 sps:$4 sm:$0xff]  }
 0x127   :  { %v504_v25 = vpop.f32.mrf.mxu0  ;;  %v543_v26 = vpop.f32.mrf.mxu1  ;;  %2472 = vmatprep.subr.bf16.mxu1 %v4684_v18  ;;  %v4691_v18 = vld [vmem:[#allocation6 + $0x1e0] ss:$12 sps:$4 sm:$0xff]  }
 0x128   :  { %v594_v28 = vmax.f32 %v503_v22, 0.0  ;;  %v505_v29 = vadd.f32 %v504_v25, %v176_v19  ;;  %v544_v59 = vadd.f32 %v543_v26, %v180_v43  ;;  %v4712_v22 = vld [vmem:[#allocation6] ss:$12 sps:$4 sm:$0xff]   ;;  %v4697_v25 = vld [vmem:[#allocation6 + $0x1c8] ss:$12 sps:$4 sm:$0xff]  }
 0x129   :  { %v506_v30 = vpop.f32.mrf.mxu0  ;;  %v545_v33 = vpop.f32.mrf.mxu1  ;;  %v4705_v26 = vld [vmem:[#allocation6 + $0x1b4] ss:$12 sps:$4 sm:$0xff]  }
 0x12a   :  { %v603_v34 = vpack.c.bf16 %v594_v28, %v594_v28  ;;  %v595_v35 = vmax.f32 %v505_v29, 0.0  ;;  %2473 = vmatpush1.bf16.msra.mxu1 %v4682_v23  ;;  %v546_v49 = vadd.f32 %v545_v33, %v184_v32  ;;  %v596_v2 = vmax.f32 %v544_v59, 0.0  ;;  %v4703_v28 = vld [vmem:[#allocation6 + $0x1b0] ss:$12 sps:$4 sm:$0xff]   ;;  %v4709_v30 = vld [vmem:[#allocation6 + $0x198] ss:$12 sps:$4 sm:$0xff]  }
 0x12b   :  { %v507_v38 = vpop.f32.mrf.mxu0  ;;  %v547_v39 = vpop.f32.mrf.mxu1  ;;  %2474 = vmatprep.subr.bf16.mxu1 %v4690_v27  ;;  %v4718_v27 = vld [vmem:[#allocation6 + $0x168] ss:$12 sps:$4 sm:$0xff]   ;;  %v4715_v32 = vld [vmem:[#allocation6 + $0x180] ss:$12 sps:$4 sm:$0xff]   ;;  %v4751_v59 = vld [vmem:[#allocation6 + $0x270] ss:$12 sps:$4 sm:$0xff]  }
 0x12c   :  { %v604_v41 = vpack.c.bf16 %v595_v35, %v595_v35  ;;  %v614_v42 = vrot.slane %v603_v34, 4  ;;  %v597_v60 = vmax.f32 %v546_v49, 0.0  ;;  %v605_v13 = vpack.c.bf16 %v596_v2, %v596_v2  ;;  %v4711_v29 = vld [vmem:[#allocation6 + $0x19c] ss:$12 sps:$4 sm:$0xff]   ;;  %v4723_v33 = vld [vmem:[#allocation6 + $0x2ec] ss:$12 sps:$4 sm:$0xff]  }
 0x12d   :  { %v548_v50 = vpop.f32.mrf.mxu1  ;;  %v4726_v35 = vld [vmem:[#allocation6 + $0x154] ss:$12 sps:$4 sm:$0xff]   ;;  %v4727_v38 = vld [vmem:[#allocation6 + $0x2d0] ss:$12 sps:$4 sm:$0xff]  }
 0x12e   :  { %v615_v51 = vrot.slane %v604_v41, 4  ;;  %2475 = vmatpush1.bf16.msra.mxu1 %v4688_v36  ;;  %v631_v58 = vsel %vm620_vm2, %v602_v52, %v614_v42  ;;  %v606_v4 = vpack.c.bf16 %v597_v60, %v597_v60  ;;  %v4724_v36 = vld [vmem:[#allocation6 + $0x150] ss:$12 sps:$4 sm:$0xff]   ;;  %v4733_v42 = vld [vmem:[#allocation6 + $0x2b8] ss:$12 sps:$4 sm:$0xff]  }
 0x12f   :  { %2476 = vmatprep.subr.bf16.mxu1 %v4696_v40  ;;  %v4732_v39 = vld [vmem:[#allocation6 + $0x13c] ss:$12 sps:$4 sm:$0xff]   ;;  %v4730_v40 = vld [vmem:[#allocation6 + $0x138] ss:$12 sps:$4 sm:$0xff]   ;;  %v4736_v43 = vld [vmem:[#allocation6 + $0x120] ss:$12 sps:$4 sm:$0xff]  }
 0x130   :  { %v635_v55 = vsel %vm620_vm2, %v603_v34, %v615_v51  ;;  %v618_v14 = vrot.slane %v606_v4, 4  ;;  %v4721_v34 = vld [vmem:[#allocation6 + $0x2e8] ss:$12 sps:$4 sm:$0xff]   ;;  %v4738_v49 = vld [vmem:[#allocation6 + $0x124] ss:$12 sps:$4 sm:$0xff]  }
 0x131   :  { %1083 = vmatprep.mubr.bf16.mxu1 %v635_v55  ;;  %1126 = vmatprep.mubr.bf16.mxu0 %v635_v55  ;;  %v4735_v41 = vld [vmem:[#allocation6 + $0x2bc] ss:$12 sps:$4 sm:$0xff]   ;;  %v4741_v50 = vld [vmem:[#allocation6 + $0x2a4] ss:$12 sps:$4 sm:$0xff]   ;;  %v4739_v51 = vld [vmem:[#allocation6 + $0x2a0] ss:$12 sps:$4 sm:$0xff]  }
 0x132   :  { %1084 = vmatmul.mubr.bf16.gmra.mxu1 %v631_v58  ;;  %1127 = vmatmul.mubr.bf16.vlgmr.msra.gmra.mxu0 %v631_v58  ;;  %v639_v21 = vsel %vm620_vm2, %v605_v13, %v618_v14  ;;  %v4744_v52 = vld [vmem:[#allocation6 + $0x10c] ss:$12 sps:$4 sm:$0xff]   ;;  %v4745_v55 = vld [vmem:[#allocation6 + $0x288] ss:$12 sps:$4 sm:$0xff]   ;;  %v4765_v2 = vld [vmem:[#allocation6 + $0x244] ss:$12 sps:$4 sm:$0xff]  }
 0x133   :  { %2510 = vmatpush1.bf16.msra.mxu0 %v4673_v53  ;;  %2477 = vmatpush1.bf16.msra.mxu1 %v4694_v54  ;;  %v4747_v53 = vld [vmem:[#allocation6 + $0x28c] ss:$12 sps:$4 sm:$0xff]   ;;  %v4742_v54 = vld [vmem:[#allocation6 + $0x108] ss:$12 sps:$4 sm:$0xff]  }
 0x134   :  { %2511 = vmatprep.subr.bf16.mxu0 %v4681_v56  ;;  %2478 = vmatprep.subr.bf16.mxu1 %v4702_v57  ;;  %v4750_v56 = vld [vmem:[#allocation6 + $0xf4] ss:$12 sps:$4 sm:$0xff]   ;;  %v4748_v57 = vld [vmem:[#allocation6 + $0xf0] ss:$12 sps:$4 sm:$0xff]  }
 0x135   :  { %v584_v3 = vpop.f32.mrf.mxu0  ;;  %v4753_v58 = vld [vmem:[#allocation6 + $0x274] ss:$12 sps:$4 sm:$0xff]   ;;  %v4756_v60 = vld [vmem:[#allocation6 + $0xdc] ss:$12 sps:$4 sm:$0xff]  }
 0x136   :  { %v585_v5 = vadd.f32 %v3928_v48, %v584_v3  ;;  %v4754_v48 = vld [vmem:[#allocation6 + $0xd8] ss:$12 sps:$4 sm:$0xff]   ;;  %v4763_v3 = vld [vmem:[#allocation6 + $0x240] ss:$12 sps:$4 sm:$0xff]  }
 0x137   :  { %v4502_v6 = vpop.f32.mrf.mxu0  ;;  %2512 = vmatpush1.bf16.msra.mxu0 %v4679_v61  ;;  %2479 = vmatpush1.bf16.msra.mxu1 %v4700_v62  ;;  %v4759_v61 = vld [vmem:[#allocation6 + $0x25c] ss:$12 sps:$4 sm:$0xff]   ;;  %v4757_v62 = vld [vmem:[#allocation6 + $0x258] ss:$12 sps:$4 sm:$0xff]  }
 0x138   :  { %v598_v9 = vmax.f32 %v585_v5, 0.0  ;;  %2513 = vmatprep.subr.bf16.mxu0 %v4687_v63  ;;  %2480 = vmatprep.subr.bf16.mxu1 %v4708_v1  ;;  %v4762_v63 = vld [vmem:[#allocation6 + $0xc4] ss:$12 sps:$4 sm:$0xff]   ;;  %v4760_v1 = vld [vmem:[#allocation6 + $0xc0] ss:$12 sps:$4 sm:$0xff]  }
 0x139   :  { %v587_v15 = vpop.f32.mrf.mxu0  ;;  %v4771_v5 = vld [vmem:[#allocation6 + $0x52c] ss:$12 sps:$4 sm:$0xff]  }
 0x13a   :  { %v607_v16 = vpack.c.bf16 %v598_v9, %v598_v9 }
 0x13b   :  { %v4503_v17 = vpop.f32.mrf.mxu0  ;;  %2514 = vmatpush1.bf16.msra.mxu0 %v4685_v7  ;;  %2481 = vmatpush1.bf16.msra.mxu1 %v4706_v8  ;;  %v709_v8 = vld [vmem:[%s5465_s4] sm:$0x3] }
 0x13c   :  { %v619_v19 = vrot.slane %v607_v16, 4  ;;  %2515 = vmatprep.subr.bf16.mxu0 %v4693_v10  ;;  %2482 = vmatprep.subr.bf16.mxu1 %v4714_v12  ;;  %v5371_v9 = vrot.slane %v709_v8, %v5327_v45  ;;  %v718_v12 = vrot.slane %v709_v8, %v5333_v47  ;;  %v4798_v8 = vld [vmem:[#allocation6 + $0x334] ss:$12 sps:$4 sm:$0xff]  }
 0x13e   :  { %v643_v23 = vsel %vm620_vm2, %v606_v4, %v619_v19  ;;  %v4768_v4 = vld [vmem:[#allocation6 + $0x3ac] ss:$12 sps:$4 sm:$0xff]  }
 0x13f   :  { %1136 = vmatprep.mubr.bf16.mxu0 %v643_v23  ;;  %2516 = vmatpush1.bf16.msra.mxu0 %v4691_v18 }
 0x140   :  { %1137 = vmatmul.mubr.bf16.gmra.mxu0 %v639_v21  ;;  %2517 = vmatprep.subr.bf16.mxu0 %v4699_v20 }
 0x141   :  { %2483 = vmatpush1.bf16.msra.mxu1 %v4712_v22 }
 0x142   :  { %2484 = vmatprep.subr.bf16.mxu1 %v4720_v24 }
 0x143   :  { %2518 = vmatpush1.bf16.msra.mxu0 %v4697_v25 }
 0x144   :  { %2519 = vmatprep.subr.bf16.mxu0 %v4705_v26 }
 0x145   :  { %2485 = vmatpush2.bf16.msra.mxu1 %v4718_v27 }
 0x146   :  { %2486 = vmatprep.subr.bf16.mxu1 %v4726_v35 }
 0x147   :  { %2520 = vmatpush1.bf16.msra.mxu0 %v4703_v28 }
 0x148   :  { %2521 = vmatprep.subr.bf16.mxu0 %v4711_v29 }
 0x149   :  { %2487 = vmatpush2.bf16.msra.mxu1 %v4724_v36  ;;  %v4774_v36 = vld [vmem:[#allocation6 + $0x394] ss:$12 sps:$4 sm:$0xff]  }
 0x14a   :  { %2488 = vmatprep.subr.bf16.mxu1 %v4732_v39 }
 0x14b   :  { %2522 = vmatpush1.bf16.msra.mxu0 %v4709_v30 }
 0x14c   :  { %2523 = vmatprep.subr.bf16.mxu0 %v4717_v31 }
 0x14d   :  { %2489 = vmatpush2.bf16.msra.mxu1 %v4730_v40 }
 0x14e   :  { %2490 = vmatprep.subr.bf16.mxu1 %v4738_v49 }
 0x14f   :  { %2524 = vmatpush1.bf16.msra.mxu0 %v4715_v32 }
 0x150   :  { %2525 = vmatprep.subr.bf16.mxu0 %v4723_v33 }
 0x151   :  { %2491 = vmatpush2.bf16.msra.mxu1 %v4736_v43 }
 0x152   :  { %2492 = vmatprep.subr.bf16.mxu1 %v4744_v52  ;;  %v4775_v52 = vld [vmem:[#allocation6 + $0x510] ss:$12 sps:$4 sm:$0xff]  }
 0x153   :  { %2526 = vmatpush2.bf16.msra.mxu0 %v4721_v34  ;;  %v4766_v34 = vld [vmem:[#allocation6 + $0x3a8] ss:$12 sps:$4 sm:$0xff]  }
 0x154   :  { %2527 = vmatprep.subr.bf16.mxu0 %v4729_v37 }
 0x155   :  { %2493 = vmatpush2.bf16.msra.mxu1 %v4742_v54  ;;  %v4783_v54 = vld [vmem:[#allocation6 + $0x4fc] ss:$12 sps:$4 sm:$0xff]  }
 0x156   :  { %2494 = vmatprep.subr.bf16.mxu1 %v4750_v56 }
 0x157   :  { %2528 = vmatpush2.bf16.msra.mxu0 %v4727_v38  ;;  %v4769_v38 = vld [vmem:[#allocation6 + $0x528] ss:$12 sps:$4 sm:$0xff]  }
 0x158   :  { %2529 = vmatprep.subr.bf16.mxu0 %v4735_v41  ;;  %v4777_v41 = vld [vmem:[#allocation6 + $0x514] ss:$12 sps:$4 sm:$0xff]  }
 0x159   :  { %2495 = vmatpush2.bf16.msra.mxu1 %v4748_v57  ;;  %v4778_v57 = vld [vmem:[#allocation6 + $0x378] ss:$12 sps:$4 sm:$0xff]  }
 0x15a   :  { %2496 = vmatprep.subr.bf16.mxu1 %v4756_v60 }
 0x15b   :  { %2530 = vmatpush2.bf16.msra.mxu0 %v4733_v42  ;;  %v4772_v42 = vld [vmem:[#allocation6 + $0x390] ss:$12 sps:$4 sm:$0xff]  }
 0x15c   :  { %2531 = vmatprep.subr.bf16.mxu0 %v4741_v50  ;;  %v4780_v50 = vld [vmem:[#allocation6 + $0x37c] ss:$12 sps:$4 sm:$0xff]  }
 0x15d   :  { %2497 = vmatpush2.bf16.msra.mxu1 %v4754_v48  ;;  %v4781_v48 = vld [vmem:[#allocation6 + $0x4f8] ss:$12 sps:$4 sm:$0xff]  }
 0x15e   :  { %2498 = vmatprep.subr.bf16.mxu1 %v4762_v63 }
 0x15f   :  { %2532 = vmatpush2.bf16.msra.mxu0 %v4739_v51 }
 0x160   :  { %2533 = vmatprep.subr.bf16.mxu0 %v4747_v53 }
 0x161   :  { %2499 = vmatpush2.bf16.msra.mxu1 %v4760_v1  ;;  %v4784_v1 = vld [vmem:[#allocation6 + $0x360] ss:$12 sps:$4 sm:$0xff]  }
 0x162   :  { %2550 = vmatprep.subr.bf16.mxu1 %v4768_v4  ;;  %v4787_v4 = vld [vmem:[#allocation6 + $0x4e0] ss:$12 sps:$4 sm:$0xff]  }
 0x163   :  { %2534 = vmatpush2.bf16.msra.mxu0 %v4745_v55 }
 0x164   :  { %2535 = vmatprep.subr.bf16.mxu0 %v4753_v58 }
 0x167   :  { %2536 = vmatpush2.bf16.msra.mxu0 %v4751_v59  ;;  %v4786_v59 = vld [vmem:[#allocation6 + $0x364] ss:$12 sps:$4 sm:$0xff]  }
 0x168   :  { %2537 = vmatprep.subr.bf16.mxu0 %v4759_v61  ;;  %v4789_v61 = vld [vmem:[#allocation6 + $0x4e4] ss:$12 sps:$4 sm:$0xff]  }
 0x16b   :  { %2538 = vmatpush2.bf16.msra.mxu0 %v4757_v62 }
 0x16c   :  { %2539 = vmatprep.subr.bf16.mxu0 %v4765_v2  ;;  %v4792_v2 = vld [vmem:[#allocation6 + $0x34c] ss:$12 sps:$4 sm:$0xff]  }
 0x16f   :  { %2540 = vmatpush2.bf16.msra.mxu0 %v4763_v3 }
 0x170   :  { %2591 = vmatprep.subr.bf16.mxu0 %v4771_v5  ;;  %v4795_v5 = vld [vmem:[#allocation6 + $0x4cc] ss:$12 sps:$4 sm:$0xff]  }
 0x1e1   :  { %v1075_v6 = vpop.f32.mrf.mxu1 }
 0x1e2   :  { %v1076_v14 = vadd.f32 %v1075_v6, %v5371_v9  ;;  %v4790_v6 = vld [vmem:[#allocation6 + $0x348] ss:$12 sps:$4 sm:$0xff]  }
 0x1e3   :  { %v1077_v7 = vpop.f32.mrf.mxu1 }
 0x1e4   :  { %v1078_v17 = vadd.f32 %v1077_v7, %v718_v12 }
 0x1e5   :  { %v1079_v10 = vpop.f32.mrf.mxu1 }
 0x1e6   :  { %v1080_v18 = vadd.f32 %v1079_v10, %v5371_v9  ;;  %v4793_v10 = vld [vmem:[#allocation6 + $0x4c8] ss:$12 sps:$4 sm:$0xff]  }
 0x1e7   :  { %v1081_v15 = vpop.f32.mrf.mxu1 }
 0x1e8   :  { %v1082_v22 = vadd.f32 %v1081_v15, %v718_v12  ;;  %v4799_v15 = vld [vmem:[#allocation6 + $0x4b0] ss:$12 sps:$4 sm:$0xff]  }
 0x1f2   :  { %v1128_v13 = vpop.f32.mrf.mxu0  ;;  %v5376_v19 = vpop.f32.mrf.mxu1 }
 0x1f3   :  { %v1129_v20 = vadd.f32 %v1128_v13, %v1076_v14  ;;  %v4796_v13 = vld [vmem:[#allocation6 + $0x330] ss:$12 sps:$4 sm:$0xff]  }
 0x1f4   :  { %v1130_v16 = vpop.f32.mrf.mxu0  ;;  %v1087_v29 = vpop.f32.mrf.mxu1  ;;  %v4804_v14 = vld [vmem:[#allocation6 + $0x31c] ss:$12 sps:$4 sm:$0xff]  }
 0x1f5   :  { %v1131_v23 = vadd.f32 %v1130_v16, %v1078_v17  ;;  %v1147_v28 = vmax.f32 %v1129_v20, 0.0  ;;  %v1088_v51 = vadd.f32 %v1087_v29, %v718_v12  ;;  %v4807_v16 = vld [vmem:[#allocation6 + $0x49c] ss:$12 sps:$4 sm:$0xff]   ;;  %v4802_v17 = vld [vmem:[#allocation6 + $0x318] ss:$12 sps:$4 sm:$0xff]  }
 0x1f6   :  { %v1132_v21 = vpop.f32.mrf.mxu0  ;;  %v5382_v35 = vpop.f32.mrf.mxu1  ;;  %v4805_v20 = vld [vmem:[#allocation6 + $0x498] ss:$12 sps:$4 sm:$0xff]   ;;  %v4825_v29 = vld [vmem:[#allocation6 + $0x5d4] ss:$12 sps:$4 sm:$0xff]  }
 0x1f7   :  { %v1133_v24 = vadd.f32 %v1132_v21, %v1080_v18  ;;  %v1148_v30 = vmax.f32 %v1131_v23, 0.0  ;;  %v4810_v18 = vld [vmem:[#allocation6 + $0x304] ss:$12 sps:$4 sm:$0xff]   ;;  %v4816_v23 = vld [vmem:[#allocation6 + $0x46c] ss:$12 sps:$4 sm:$0xff]  }
 0x1f8   :  { %v1134_v25 = vpop.f32.mrf.mxu0  ;;  %v1091_v43 = vpop.f32.mrf.mxu1  ;;  %v4813_v21 = vld [vmem:[#allocation6 + $0x484] ss:$12 sps:$4 sm:$0xff]  }
 0x1f9   :  { %v1149_v26 = vmax.f32 %v1133_v24, 0.0  ;;  %v1135_v27 = vadd.f32 %v1134_v25, %v1082_v22  ;;  %v1092_v55 = vadd.f32 %v1091_v43, %v718_v12  ;;  %v4801_v12 = vld [vmem:[#allocation6 + $0x4b4] ss:$12 sps:$4 sm:$0xff]   ;;  %v4819_v25 = vld [vmem:[#allocation6 + $0x5ec] ss:$12 sps:$4 sm:$0xff]  }
 0x1fa   :  { %v4808_v22 = vld [vmem:[#allocation6 + $0x300] ss:$12 sps:$4 sm:$0xff]   ;;  %v4837_v43 = vld [vmem:[#allocation6 + $0x5a4] ss:$12 sps:$4 sm:$0xff]  }
 0x1fb   :  { %v1150_v31 = vmax.f32 %v1135_v27, 0.0  ;;  %v5378_v32 = vpack.c.bf16 %v1149_v26, %v1147_v28  ;;  %v4811_v24 = vld [vmem:[#allocation6 + $0x480] ss:$12 sps:$4 sm:$0xff]   ;;  %v4814_v26 = vld [vmem:[#allocation6 + $0x468] ss:$12 sps:$4 sm:$0xff]  }
 0x1fc   :  { %v4822_v27 = vld [vmem:[#allocation6 + $0x454] ss:$12 sps:$4 sm:$0xff]  }
 0x1fd   :  { %v5380_v33 = vpack.c.bf16 %v1150_v31, %v1148_v30  ;;  %v1161_v39 = vrot.slane %v5378_v32, 4  ;;  %v4817_v28 = vld [vmem:[#allocation6 + $0x5e8] ss:$12 sps:$4 sm:$0xff]   ;;  %v4820_v30 = vld [vmem:[#allocation6 + $0x450] ss:$12 sps:$4 sm:$0xff]  }
 0x1fe   :  { %v4828_v31 = vld [vmem:[#allocation6 + $0x43c] ss:$12 sps:$4 sm:$0xff]  }
 0x1ff   :  { %2500 = vmatprep.mubr.bf16.mxu1 %v5380_v33  ;;  %v1162_v37 = vrot.slane %v5380_v33, 4 }
 0x200   :  { %v5387_v40 = vpop.f32.mrf.mxu0  ;;  %2501 = vmatmul.mubr.bf16.vlgmr.msra.gmra.mxu1 %v5378_v32 }
 0x201   :  { %2551 = vmatpush1.bf16.msra.mxu1 %v4766_v34  ;;  %2541 = vmatprep.mubr.bf16.mxu0 %v1162_v37  ;;  %v4823_v34 = vld [vmem:[#allocation6 + $0x5d0] ss:$12 sps:$4 sm:$0xff]  }
 0x202   :  { %v1140_v49 = vpop.f32.mrf.mxu0  ;;  %2542 = vmatmul.mubr.bf16.vlgmr.msra.gmra.mxu0 %v1161_v39  ;;  %2552 = vmatprep.subr.bf16.mxu1 %v4774_v36  ;;  %v4831_v36 = vld [vmem:[#allocation6 + $0x5bc] ss:$12 sps:$4 sm:$0xff]  }
 0x203   :  { %2592 = vmatpush1.bf16.msra.mxu0 %v4769_v38  ;;  %v1141_v56 = vadd.f32 %v1140_v49, %v1088_v51  ;;  %v4826_v38 = vld [vmem:[#allocation6 + $0x438] ss:$12 sps:$4 sm:$0xff]   ;;  %v4832_v49 = vld [vmem:[#allocation6 + $0x420] ss:$12 sps:$4 sm:$0xff]  }
 0x204   :  { %v5394_v53 = vpop.f32.mrf.mxu0  ;;  %2593 = vmatprep.subr.bf16.mxu0 %v4777_v41  ;;  %v4834_v41 = vld [vmem:[#allocation6 + $0x424] ss:$12 sps:$4 sm:$0xff]   ;;  %v4835_v51 = vld [vmem:[#allocation6 + $0x5a0] ss:$12 sps:$4 sm:$0xff]  }
 0x205   :  { %2553 = vmatpush1.bf16.msra.mxu1 %v4772_v42  ;;  %v1152_v62 = vmax.f32 %v1141_v56, 0.0  ;;  %v4829_v42 = vld [vmem:[#allocation6 + $0x5b8] ss:$12 sps:$4 sm:$0xff]   ;;  %v4841_v56 = vld [vmem:[#allocation6 + $0x588] ss:$12 sps:$4 sm:$0xff]  }
 0x206   :  { %v1144_v58 = vpop.f32.mrf.mxu0  ;;  %2554 = vmatprep.subr.bf16.mxu1 %v4780_v50  ;;  %v4840_v50 = vld [vmem:[#allocation6 + $0x40c] ss:$12 sps:$4 sm:$0xff]  }
 0x207   :  { %v1145_v60 = vadd.f32 %v1144_v58, %v1092_v55  ;;  %2594 = vmatpush1.bf16.msra.mxu0 %v4775_v52  ;;  %v4843_v52 = vld [vmem:[#allocation6 + $0x58c] ss:$12 sps:$4 sm:$0xff]   ;;  %v4846_v55 = vld [vmem:[#allocation6 + $0x3f4] ss:$12 sps:$4 sm:$0xff]   ;;  %v4844_v58 = vld [vmem:[#allocation6 + $0x3f0] ss:$12 sps:$4 sm:$0xff]  }
 0x208   :  { %2595 = vmatprep.subr.bf16.mxu0 %v4783_v54  ;;  %v4838_v54 = vld [vmem:[#allocation6 + $0x408] ss:$12 sps:$4 sm:$0xff]  }
 0x209   :  { %v1154_v63 = vmax.f32 %v1145_v60, 0.0  ;;  %2555 = vmatpush1.bf16.msra.mxu1 %v4778_v57  ;;  %v4849_v57 = vld [vmem:[#allocation6 + $0x574] ss:$12 sps:$4 sm:$0xff]   ;;  %v4852_v60 = vld [vmem:[#allocation6 + $0x3dc] ss:$12 sps:$4 sm:$0xff]  }
 0x20a   :  { %2556 = vmatprep.subr.bf16.mxu1 %v4786_v59  ;;  %v1090_v59 = vadd.f32 %v5382_v35, %v5371_v9 }
 0x20b   :  { %v5396_v3 = vpack.c.bf16 %v1154_v63, %v1152_v62  ;;  %2596 = vmatpush1.bf16.msra.mxu0 %v4781_v48  ;;  %v4847_v48 = vld [vmem:[#allocation6 + $0x570] ss:$12 sps:$4 sm:$0xff]  }
 0x20c   :  { %2597 = vmatprep.subr.bf16.mxu0 %v4789_v61  ;;  %v1086_v61 = vadd.f32 %v5376_v19, %v5371_v9  ;;  %v1143_v62 = vadd.f32 %v5394_v53, %v1090_v59  ;;  %v4855_v63 = vld [vmem:[#allocation6 + $0x55c] ss:$12 sps:$4 sm:$0xff]   ;;  %v4859_v19 = vld [vmem:[#allocation6 + $0x540] ss:$12 sps:$4 sm:$0xff]   ;;  %v4900_v59 = vld [vmem:[#allocation6 + $0x5d8] ss:$12 sps:$4 sm:$0xff]  }
 0x20d   :  { %2557 = vmatpush1.bf16.msra.mxu1 %v4784_v1  ;;  %2582 = vmatprep.mubr.bf16.mxu1 %v5396_v3  ;;  %v1168_v7 = vrot.slane %v5396_v3, 4  ;;  %v4850_v1 = vld [vmem:[#allocation6 + $0x3d8] ss:$12 sps:$4 sm:$0xff]   ;;  %v4862_v9 = vld [vmem:[#allocation6 + $0x170] ss:$12 sps:$4 sm:$0xff]  }
 0x20e   :  { %2558 = vmatprep.subr.bf16.mxu1 %v4792_v2  ;;  %v1139_v2 = vadd.f32 %v5387_v40, %v1086_v61  ;;  %v1153_v35 = vmax.f32 %v1143_v62, 0.0  ;;  %v4863_v40 = vld [vmem:[#allocation6 + $0xb0] ss:$12 sps:$4 sm:$0xff]   ;;  %v4901_v61 = vld [vmem:[#allocation6 + $0x518] ss:$12 sps:$4 sm:$0xff]  }
 0x20f   :  { %2598 = vmatpush1.bf16.msra.mxu0 %v4787_v4  ;;  %2623 = vmatprep.mubr.bf16.mxu0 %v1168_v7  ;;  %v4858_v4 = vld [vmem:[#allocation6 + $0x3c4] ss:$12 sps:$4 sm:$0xff]   ;;  %v4904_v62 = vld [vmem:[#allocation6 + $0x5c0] ss:$12 sps:$4 sm:$0xff]  }
 0x210   :  { %2599 = vmatprep.subr.bf16.mxu0 %v4795_v5  ;;  %v4853_v5 = vld [vmem:[#allocation6 + $0x558] ss:$12 sps:$4 sm:$0xff]  }
 0x211   :  { %2559 = vmatpush1.bf16.msra.mxu1 %v4790_v6  ;;  %v4861_v6 = vld [vmem:[#allocation6 + $0x544] ss:$12 sps:$4 sm:$0xff]  }
 0x212   :  { %2560 = vmatprep.subr.bf16.mxu1 %v4798_v8  ;;  %v4856_v8 = vld [vmem:[#allocation6 + $0x3c0] ss:$12 sps:$4 sm:$0xff]  }
 0x213   :  { %2600 = vmatpush1.bf16.msra.mxu0 %v4793_v10  ;;  %v1151_v10 = vmax.f32 %v1139_v2, 0.0  ;;  %v4905_v2 = vld [vmem:[#allocation6 + $0x500] ss:$12 sps:$4 sm:$0xff]  }
 0x214   :  { %2601 = vmatprep.subr.bf16.mxu0 %v4801_v12  ;;  %v4864_v12 = vld [vmem:[#allocation6 + $0x2f0] ss:$12 sps:$4 sm:$0xff]  }
 0x215   :  { %2561 = vmatpush1.bf16.msra.mxu1 %v4796_v13  ;;  %v5408_v53 = vpack.c.bf16 %v1153_v35, %v1151_v10  ;;  %v4866_v13 = vld [vmem:[#allocation6 + $0x158] ss:$12 sps:$4 sm:$0xff]  }
 0x216   :  { %2562 = vmatprep.subr.bf16.mxu1 %v4804_v14  ;;  %v4865_v14 = vld [vmem:[#allocation6 + $0x230] ss:$12 sps:$4 sm:$0xff]   ;;  %v4914_v35 = vld [vmem:[#allocation6 + $0x3f8] ss:$12 sps:$4 sm:$0xff]  }
 0x217   :  { %2602 = vmatpush1.bf16.msra.mxu0 %v4799_v15  ;;  %v1167_v15 = vrot.slane %v5408_v53, 4  ;;  %v4915_v10 = vld [vmem:[#allocation6 + $0x338] ss:$12 sps:$4 sm:$0xff]  }
 0x218   :  { %2603 = vmatprep.subr.bf16.mxu0 %v4807_v16  ;;  %v4868_v16 = vld [vmem:[#allocation6 + $0x2d8] ss:$12 sps:$4 sm:$0xff]  }
 0x219   :  { %2563 = vmatpush1.bf16.msra.mxu1 %v4802_v17  ;;  %v4867_v17 = vld [vmem:[#allocation6 + $0x98] ss:$12 sps:$4 sm:$0xff]  }
 0x21a   :  { %2564 = vmatprep.subr.bf16.mxu1 %v4810_v18  ;;  %v4870_v18 = vld [vmem:[#allocation6 + $0x140] ss:$12 sps:$4 sm:$0xff]  }
 0x21b   :  { %2604 = vmatpush1.bf16.msra.mxu0 %v4805_v20  ;;  %v4869_v20 = vld [vmem:[#allocation6 + $0x218] ss:$12 sps:$4 sm:$0xff]  }
 0x21c   :  { %2605 = vmatprep.subr.bf16.mxu0 %v4813_v21  ;;  %v4872_v21 = vld [vmem:[#allocation6 + $0x2c0] ss:$12 sps:$4 sm:$0xff]  }
 0x21d   :  { %2565 = vmatpush1.bf16.msra.mxu1 %v4808_v22  ;;  %v4871_v22 = vld [vmem:[#allocation6 + $0x80] ss:$12 sps:$4 sm:$0xff]  }
 0x21e   :  { %2566 = vmatprep.subr.bf16.mxu1 %v4816_v23  ;;  %v4874_v23 = vld [vmem:[#allocation6 + $0x128] ss:$12 sps:$4 sm:$0xff]  }
 0x21f   :  { %2606 = vmatpush1.bf16.msra.mxu0 %v4811_v24  ;;  %v4873_v24 = vld [vmem:[#allocation6 + $0x200] ss:$12 sps:$4 sm:$0xff]  }
 0x220   :  { %2607 = vmatprep.subr.bf16.mxu0 %v4819_v25  ;;  %v4876_v25 = vld [vmem:[#allocation6 + $0x2a8] ss:$12 sps:$4 sm:$0xff]  }
 0x221   :  { %2567 = vmatpush2.bf16.msra.mxu1 %v4814_v26  ;;  %v4875_v26 = vld [vmem:[#allocation6 + $0x68] ss:$12 sps:$4 sm:$0xff]  }
 0x222   :  { %2568 = vmatprep.subr.bf16.mxu1 %v4822_v27  ;;  %v4878_v27 = vld [vmem:[#allocation6 + $0x110] ss:$12 sps:$4 sm:$0xff]  }
 0x223   :  { %2608 = vmatpush2.bf16.msra.mxu0 %v4817_v28  ;;  %v4877_v28 = vld [vmem:[#allocation6 + $0x1e8] ss:$12 sps:$4 sm:$0xff]  }
 0x224   :  { %2609 = vmatprep.subr.bf16.mxu0 %v4825_v29  ;;  %v4882_v29 = vld [vmem:[#allocation6 + $0xf8] ss:$12 sps:$4 sm:$0xff]  }
 0x225   :  { %2569 = vmatpush2.bf16.msra.mxu1 %v4820_v30  ;;  %v4881_v30 = vld [vmem:[#allocation6 + $0x1d0] ss:$12 sps:$4 sm:$0xff]  }
 0x226   :  { %2570 = vmatprep.subr.bf16.mxu1 %v4828_v31  ;;  %v4884_v31 = vld [vmem:[#allocation6 + $0x278] ss:$12 sps:$4 sm:$0xff]  }
 0x227   :  { %2610 = vmatpush2.bf16.msra.mxu0 %v4823_v34  ;;  %v4883_v34 = vld [vmem:[#allocation6 + $0x38] ss:$12 sps:$4 sm:$0xff]  }
 0x228   :  { %2611 = vmatprep.subr.bf16.mxu0 %v4831_v36  ;;  %v4886_v36 = vld [vmem:[#allocation6 + $0xe0] ss:$12 sps:$4 sm:$0xff]  }
 0x229   :  { %2571 = vmatpush2.bf16.msra.mxu1 %v4826_v38  ;;  %v4885_v38 = vld [vmem:[#allocation6 + $0x1b8] ss:$12 sps:$4 sm:$0xff]  }
 0x22a   :  { %2572 = vmatprep.subr.bf16.mxu1 %v4834_v41  ;;  %v4888_v41 = vld [vmem:[#allocation6 + $0x260] ss:$12 sps:$4 sm:$0xff]  }
 0x22b   :  { %2612 = vmatpush2.bf16.msra.mxu0 %v4829_v42  ;;  %v4887_v42 = vld [vmem:[#allocation6 + $0x20] ss:$12 sps:$4 sm:$0xff]  }
 0x22c   :  { %2613 = vmatprep.subr.bf16.mxu0 %v4837_v43  ;;  %v4890_v43 = vld [vmem:[#allocation6 + $0xc8] ss:$12 sps:$4 sm:$0xff]  }
 0x22d   :  { %2573 = vmatpush2.bf16.msra.mxu1 %v4832_v49  ;;  %v4889_v49 = vld [vmem:[#allocation6 + $0x1a0] ss:$12 sps:$4 sm:$0xff]  }
 0x22e   :  { %2574 = vmatprep.subr.bf16.mxu1 %v4840_v50  ;;  %v4892_v50 = vld [vmem:[#allocation6 + $0x248] ss:$12 sps:$4 sm:$0xff]  }
 0x22f   :  { %2614 = vmatpush2.bf16.msra.mxu0 %v4835_v51  ;;  %v4891_v51 = vld [vmem:[#allocation6 + $0x8] ss:$12 sps:$4 sm:$0xff]  }
 0x230   :  { %2615 = vmatprep.subr.bf16.mxu0 %v4843_v52  ;;  %v4894_v52 = vld [vmem:[#allocation6 + $0x470] ss:$12 sps:$4 sm:$0xff]  }
 0x231   :  { %2575 = vmatpush2.bf16.msra.mxu1 %v4838_v54  ;;  %v4893_v54 = vld [vmem:[#allocation6 + $0x188] ss:$12 sps:$4 sm:$0xff]  }
 0x232   :  { %2576 = vmatprep.subr.bf16.mxu1 %v4846_v55  ;;  %v4896_v55 = vld [vmem:[#allocation6 + $0x5f0] ss:$12 sps:$4 sm:$0xff]  }
 0x233   :  { %2616 = vmatpush2.bf16.msra.mxu0 %v4841_v56  ;;  %v4895_v56 = vld [vmem:[#allocation6 + $0x3b0] ss:$12 sps:$4 sm:$0xff]  }
 0x234   :  { %2617 = vmatprep.subr.bf16.mxu0 %v4849_v57  ;;  %v4898_v57 = vld [vmem:[#allocation6 + $0x458] ss:$12 sps:$4 sm:$0xff]  }
 0x235   :  { %2577 = vmatpush2.bf16.msra.mxu1 %v4844_v58  ;;  %v4897_v58 = vld [vmem:[#allocation6 + $0x530] ss:$12 sps:$4 sm:$0xff]  }
 0x236   :  { %2578 = vmatprep.subr.bf16.mxu1 %v4852_v60  ;;  %v4899_v60 = vld [vmem:[#allocation6 + $0x398] ss:$12 sps:$4 sm:$0xff]  }
 0x237   :  { %2618 = vmatpush2.bf16.msra.mxu0 %v4847_v48  ;;  %v4902_v48 = vld [vmem:[#allocation6 + $0x440] ss:$12 sps:$4 sm:$0xff]  }
 0x238   :  { %2619 = vmatprep.subr.bf16.mxu0 %v4855_v63  ;;  %v4903_v63 = vld [vmem:[#allocation6 + $0x380] ss:$12 sps:$4 sm:$0xff]  }
 0x239   :  { %2579 = vmatpush2.bf16.msra.mxu1 %v4850_v1  ;;  %v4906_v1 = vld [vmem:[#allocation6 + $0x428] ss:$12 sps:$4 sm:$0xff]  }
 0x23a   :  { %2580 = vmatprep.subr.bf16.mxu1 %v4858_v4  ;;  %v4908_v4 = vld [vmem:[#allocation6 + $0x5a8] ss:$12 sps:$4 sm:$0xff]  }
 0x23b   :  { %2620 = vmatpush2.bf16.msra.mxu0 %v4853_v5  ;;  %v4909_v5 = vld [vmem:[#allocation6 + $0x4e8] ss:$12 sps:$4 sm:$0xff]  }
 0x23c   :  { %2621 = vmatprep.subr.bf16.mxu0 %v4861_v6  ;;  %v4913_v6 = vld [vmem:[#allocation6 + $0x4d0] ss:$12 sps:$4 sm:$0xff]  }
 0x23d   :  { %2581 = vmatpush2.bf16.msra.mxu1 %v4856_v8  ;;  %v4916_v8 = vld [vmem:[#allocation6 + $0x578] ss:$12 sps:$4 sm:$0xff]  }
 0x23e   :  { %4360 = vmatprep.subr.bf16.mxu1 %v4862_v9  ;;  %v4918_v9 = vld [vmem:[#allocation6 + $0x3e0] ss:$12 sps:$4 sm:$0xff]  }
 0x23f   :  { %2622 = vmatpush2.bf16.msra.mxu0 %v4859_v19  ;;  %v4917_v19 = vld [vmem:[#allocation6 + $0x4b8] ss:$12 sps:$4 sm:$0xff]  }
 0x240   :  { %2583 = vmatmul.mubr.bf16.vlgmr.msra.gmra.mxu1 %v5408_v53  ;;  %4382 = vmatprep.subr.bf16.mxu0 %v4864_v12  ;;  %v4920_v12 = vld [vmem:[#allocation6 + $0x560] ss:$12 sps:$4 sm:$0xff]  }
 0x241   :  { %4361 = vmatpush3.bf16.msra.mxu1 %v4863_v40  ;;  %2664 = vmatprep.mubr.bf16.mxu1 %v5380_v33  ;;  %v4880_v33 = vld [vmem:[#allocation6 + $0x290] ss:$12 sps:$4 sm:$0xff]   ;;  %v4919_v40 = vld [vmem:[#allocation6 + $0x320] ss:$12 sps:$4 sm:$0xff]  }
 0x242   :  { %2624 = vmatmul.mubr.bf16.vlgmr.msra.gmra.mxu0 %v1167_v15  ;;  %4362 = vmatprep.subr.bf16.mxu1 %v4866_v13  ;;  %v4922_v13 = vld [vmem:[#allocation6 + $0x3c8] ss:$12 sps:$4 sm:$0xff]  }
 0x243   :  { %4383 = vmatpush3.bf16.msra.mxu0 %v4865_v14  ;;  %2704 = vmatprep.mubr.bf16.mxu0 %v1162_v37  ;;  %v4879_v37 = vld [vmem:[#allocation6 + $0x50] ss:$12 sps:$4 sm:$0xff]   ;;  %v4921_v14 = vld [vmem:[#allocation6 + $0x4a0] ss:$12 sps:$4 sm:$0xff]  }
 0x244   :  { %4384 = vmatprep.subr.bf16.mxu0 %v4868_v16  ;;  %v4924_v16 = vld [vmem:[#allocation6 + $0x548] ss:$12 sps:$4 sm:$0xff]  }
 0x245   :  { %4363 = vmatpush3.bf16.msra.mxu1 %v4867_v17  ;;  %v4923_v17 = vld [vmem:[#allocation6 + $0x308] ss:$12 sps:$4 sm:$0xff]  }
 0x246   :  { %4364 = vmatprep.subr.bf16.mxu1 %v4870_v18  ;;  %v4928_v18 = vld [vmem:[#allocation7 + $0xe4] ss:$16 sps:$4 sm:$0xff]  }
 0x247   :  { %4385 = vmatpush3.bf16.msra.mxu0 %v4869_v20  ;;  %v4925_v20 = vld [vmem:[#allocation6 + $0x488] ss:$12 sps:$4 sm:$0xff]  }
 0x248   :  { %4386 = vmatprep.subr.bf16.mxu0 %v4872_v21  ;;  %v4926_v21 = vld [vmem:[#allocation7 + $0xe0] ss:$16 sps:$4 sm:$0xff]  }
 0x249   :  { %4365 = vmatpush3.bf16.msra.mxu1 %v4871_v22  ;;  %v4931_v22 = vld [vmem:[#allocation7 + $0xc4] ss:$16 sps:$4 sm:$0xff]  }
 0x24a   :  { %4366 = vmatprep.subr.bf16.mxu1 %v4874_v23  ;;  %v4929_v23 = vld [vmem:[#allocation7 + $0xc0] ss:$16 sps:$4 sm:$0xff]  }
 0x24b   :  { %4387 = vmatpush3.bf16.msra.mxu0 %v4873_v24  ;;  %v4934_v24 = vld [vmem:[#allocation7 + $0xa4] ss:$16 sps:$4 sm:$0xff]  }
 0x24c   :  { %4388 = vmatprep.subr.bf16.mxu0 %v4876_v25  ;;  %v4932_v25 = vld [vmem:[#allocation7 + $0xa0] ss:$16 sps:$4 sm:$0xff]  }
 0x24d   :  { %4367 = vmatpush3.bf16.msra.mxu1 %v4875_v26  ;;  %v4937_v26 = vld [vmem:[#allocation7 + $0x84] ss:$16 sps:$4 sm:$0xff]  }
 0x24e   :  { %4368 = vmatprep.subr.bf16.mxu1 %v4878_v27  ;;  %v4935_v27 = vld [vmem:[#allocation7 + $0x80] ss:$16 sps:$4 sm:$0xff]  }
 0x24f   :  { %4389 = vmatpush3.bf16.msra.mxu0 %v4877_v28  ;;  %v4940_v28 = vld [vmem:[#allocation7 + $0x64] ss:$16 sps:$4 sm:$0xff]  }
 0x250   :  { %4390 = vmatprep.subr.bf16.mxu0 %v4880_v33  ;;  %v4938_v33 = vld [vmem:[#allocation7 + $0x60] ss:$16 sps:$4 sm:$0xff]  }
 0x251   :  { %4369 = vmatpush3.bf16.msra.mxu1 %v4879_v37  ;;  %v4943_v37 = vld [vmem:[#allocation7 + $0x44] ss:$16 sps:$4 sm:$0xff]  }
 0x252   :  { %4370 = vmatprep.subr.bf16.mxu1 %v4882_v29  ;;  %v4941_v29 = vld [vmem:[#allocation7 + $0x40] ss:$16 sps:$4 sm:$0xff]  }
 0x253   :  { %4391 = vmatpush3.bf16.msra.mxu0 %v4881_v30  ;;  %v4949_v30 = vld [vmem:[#allocation7 + $0x4] ss:$16 sps:$4 sm:$0xff]  }
 0x254   :  { %4392 = vmatprep.subr.bf16.mxu0 %v4884_v31  ;;  %v4947_v31 = vld [vmem:[#allocation7] ss:$16 sps:$4 sm:$0xff]  }
 0x255   :  { %4371 = vmatpush3.bf16.msra.mxu1 %v4883_v34  ;;  %v4952_v34 = vld [vmem:[#allocation7 + $0x1e4] ss:$16 sps:$4 sm:$0xff]  }
 0x256   :  { %4372 = vmatprep.subr.bf16.mxu1 %v4886_v36  ;;  %v4950_v36 = vld [vmem:[#allocation7 + $0x1e0] ss:$16 sps:$4 sm:$0xff]  }
 0x257   :  { %4393 = vmatpush3.bf16.msra.mxu0 %v4885_v38  ;;  %v4955_v38 = vld [vmem:[#allocation7 + $0x1c4] ss:$16 sps:$4 sm:$0xff]  }
 0x258   :  { %4394 = vmatprep.subr.bf16.mxu0 %v4888_v41  ;;  %v4953_v41 = vld [vmem:[#allocation7 + $0x1c0] ss:$16 sps:$4 sm:$0xff]  }
 0x259   :  { %4373 = vmatpush3.bf16.msra.mxu1 %v4887_v42  ;;  %v4958_v42 = vld [vmem:[#allocation7 + $0x1a4] ss:$16 sps:$4 sm:$0xff]  }
 0x25a   :  { %4374 = vmatprep.subr.bf16.mxu1 %v4890_v43  ;;  %v4956_v43 = vld [vmem:[#allocation7 + $0x1a0] ss:$16 sps:$4 sm:$0xff]  }
 0x25b   :  { %4395 = vmatpush3.bf16.msra.mxu0 %v4889_v49  ;;  %v4961_v49 = vld [vmem:[#allocation7 + $0x184] ss:$16 sps:$4 sm:$0xff]  }
 0x25c   :  { %4396 = vmatprep.subr.bf16.mxu0 %v4892_v50  ;;  %v4974_v50 = vld [vmem:[#allocation7 + $0x2e0] ss:$16 sps:$4 sm:$0xff]  }
 0x25d   :  { %4375 = vmatpush3.bf16.msra.mxu1 %v4891_v51  ;;  %v4976_v51 = vld [vmem:[#allocation7 + $0x2e4] ss:$16 sps:$4 sm:$0xff]  }
 0x25e   :  { %4404 = vmatprep.subr.bf16.mxu1 %v4894_v52  ;;  %v4959_v52 = vld [vmem:[#allocation7 + $0x180] ss:$16 sps:$4 sm:$0xff]  }
 0x25f   :  { %4397 = vmatpush3.bf16.msra.mxu0 %v4893_v54  ;;  %v4982_v54 = vld [vmem:[#allocation7 + $0x2c4] ss:$16 sps:$4 sm:$0xff]  }
 0x260   :  { %2665 = vmatmul.mubr.bf16.vlgmr.msra.gmra.mxu1 %v5378_v32  ;;  %4426 = vmatprep.subr.bf16.mxu0 %v4896_v55  ;;  %v4907_v32 = vld [vmem:[#allocation6 + $0x368] ss:$12 sps:$4 sm:$0xff]  }
 0x261   :  { %4405 = vmatpush3.bf16.msra.mxu1 %v4895_v56  ;;  %2744 = vmatprep.mubr.bf16.mxu1 %v5396_v3  ;;  %v4912_v3 = vld [vmem:[#allocation6 + $0x590] ss:$12 sps:$4 sm:$0xff]   ;;  %v4964_v55 = vld [vmem:[#allocation7 + $0x164] ss:$16 sps:$4 sm:$0xff]  }
 0x262   :  { %2705 = vmatmul.mubr.bf16.vlgmr.msra.gmra.mxu0 %v1161_v39  ;;  %4406 = vmatprep.subr.bf16.mxu1 %v4898_v57  ;;  %v4910_v39 = vld [vmem:[#allocation6 + $0x410] ss:$12 sps:$4 sm:$0xff]   ;;  %v4988_v57 = vld [vmem:[#allocation7 + $0x2a4] ss:$16 sps:$4 sm:$0xff]  }
 0x263   :  { %4427 = vmatpush3.bf16.msra.mxu0 %v4897_v58  ;;  %2784 = vmatprep.mubr.bf16.mxu0 %v1168_v7  ;;  %v4911_v7 = vld [vmem:[#allocation6 + $0x350] ss:$12 sps:$4 sm:$0xff]  }
 0x264   :  { %4428 = vmatprep.subr.bf16.mxu0 %v4900_v59  ;;  %v4980_v56 = vld [vmem:[#allocation7 + $0x2c0] ss:$16 sps:$4 sm:$0xff]   ;;  %v4967_v59 = vld [vmem:[#allocation7 + $0x144] ss:$16 sps:$4 sm:$0xff]  }
 0x265   :  { %4407 = vmatpush3.bf16.msra.mxu1 %v4899_v60  ;;  %v4962_v58 = vld [vmem:[#allocation7 + $0x160] ss:$16 sps:$4 sm:$0xff]  }
 0x266   :  { %4408 = vmatprep.subr.bf16.mxu1 %v4902_v48  ;;  %v4986_v60 = vld [vmem:[#allocation7 + $0x2a0] ss:$16 sps:$4 sm:$0xff]   ;;  %v4994_v48 = vld [vmem:[#allocation7 + $0x284] ss:$16 sps:$4 sm:$0xff]  }
 0x267   :  { %4429 = vmatpush3.bf16.msra.mxu0 %v4901_v61  ;;  %v4965_v61 = vld [vmem:[#allocation7 + $0x140] ss:$16 sps:$4 sm:$0xff]  }
 0x268   :  { %4430 = vmatprep.subr.bf16.mxu0 %v4904_v62  ;;  %v4970_v62 = vld [vmem:[#allocation7 + $0x124] ss:$16 sps:$4 sm:$0xff]  }
 0x269   :  { %4409 = vmatpush3.bf16.msra.mxu1 %v4903_v63  ;;  %v4992_v63 = vld [vmem:[#allocation7 + $0x280] ss:$16 sps:$4 sm:$0xff]  }
 0x26a   :  { %4410 = vmatprep.subr.bf16.mxu1 %v4906_v1  ;;  %v5000_v1 = vld [vmem:[#allocation7 + $0x264] ss:$16 sps:$4 sm:$0xff]  }
 0x26b   :  { %4431 = vmatpush3.bf16.msra.mxu0 %v4905_v2  ;;  %v4968_v2 = vld [vmem:[#allocation7 + $0x120] ss:$16 sps:$4 sm:$0xff]  }
 0x26c   :  { %4432 = vmatprep.subr.bf16.mxu0 %v4908_v4  ;;  %v4973_v4 = vld [vmem:[#allocation7 + $0x104] ss:$16 sps:$4 sm:$0xff]  }
 0x26d   :  { %4411 = vmatpush3.bf16.msra.mxu1 %v4907_v32  ;;  %v4998_v32 = vld [vmem:[#allocation7 + $0x260] ss:$16 sps:$4 sm:$0xff]  }
 0x26e   :  { %4412 = vmatprep.subr.bf16.mxu1 %v4910_v39  ;;  %v4971_v39 = vld [vmem:[#allocation7 + $0x100] ss:$16 sps:$4 sm:$0xff]  }
 0x26f   :  { %4433 = vmatpush3.bf16.msra.mxu0 %v4909_v5  ;;  %v4979_v5 = vld [vmem:[#allocation7 + $0x2ec] ss:$16 sps:$4 sm:$0xff]  }
 0x270   :  { %4434 = vmatprep.subr.bf16.mxu0 %v4912_v3  ;;  %v5006_v3 = vld [vmem:[#allocation7 + $0x244] ss:$16 sps:$4 sm:$0xff]  }
 0x271   :  { %4413 = vmatpush3.bf16.msra.mxu1 %v4911_v7  ;;  %v5004_v7 = vld [vmem:[#allocation7 + $0x240] ss:$16 sps:$4 sm:$0xff]  }
 0x272   :  { %4414 = vmatprep.subr.bf16.mxu1 %v4914_v35 }
 0x273   :  { %4435 = vmatpush3.bf16.msra.mxu0 %v4913_v6 }
 0x274   :  { %4436 = vmatprep.subr.bf16.mxu0 %v4916_v8 }
 0x275   :  { %4415 = vmatpush3.bf16.msra.mxu1 %v4915_v10  ;;  %v5012_v10 = vld [vmem:[#allocation7 + $0x224] ss:$16 sps:$4 sm:$0xff]  }
 0x276   :  { %4416 = vmatprep.subr.bf16.mxu1 %v4918_v9  ;;  %v5010_v9 = vld [vmem:[#allocation7 + $0x220] ss:$16 sps:$4 sm:$0xff]  }
 0x277   :  { %4437 = vmatpush3.bf16.msra.mxu0 %v4917_v19 }
 0x278   :  { %4438 = vmatprep.subr.bf16.mxu0 %v4920_v12 }
 0x279   :  { %4417 = vmatpush3.bf16.msra.mxu1 %v4919_v40 }
 0x27a   :  { %4418 = vmatprep.subr.bf16.mxu1 %v4922_v13 }
 0x27b   :  { %4439 = vmatpush3.bf16.msra.mxu0 %v4921_v14  ;;  %v5018_v14 = vld [vmem:[#allocation7 + $0x204] ss:$16 sps:$4 sm:$0xff]  }
 0x27c   :  { %4440 = vmatprep.subr.bf16.mxu0 %v4924_v16  ;;  %v5016_v16 = vld [vmem:[#allocation7 + $0x200] ss:$16 sps:$4 sm:$0xff]  }
 0x27d   :  { %4419 = vmatpush3.bf16.msra.mxu1 %v4923_v17 }
 0x27e   :  { %3396 = vmatprep.subr.bf16.mxu1 %v4928_v18  ;;  %v5024_v18 = vld [vmem:[#allocation7 + $0xec] ss:$16 sps:$4 sm:$0xff]  }
 0x27f   :  { %4441 = vmatpush3.bf16.msra.mxu0 %v4925_v20  ;;  %v5430_v20 = vld [vmem:[%s5467_s6] sm:$0x7] }
 0x280   :  { %2745 = vmatmul.mubr.bf16.vlgmr.msra.gmra.mxu1 %v5408_v53  ;;  %v4946_v53 = vld [vmem:[#allocation7 + $0x24] ss:$16 sps:$4 sm:$0xff]   ;;  %3437 = vmatprep.subr.bf16.mxu0 %v4976_v51  ;;  %v4985_v51 = vld [vmem:[#allocation7 + $0x2cc] ss:$16 sps:$4 sm:$0xff]  }
 0x281   :  { %3397 = vmatpush1.bf16.msra.mxu1 %v4926_v21  ;;  %v1432_v21 = vrot.slane %v5430_v20, %v5327_v45 }
 0x282   :  { %2785 = vmatmul.mubr.bf16.vlgmr.msra.gmra.mxu0 %v1167_v15  ;;  %3398 = vmatprep.subr.bf16.mxu1 %v4931_v22  ;;  %v4944_v15 = vld [vmem:[#allocation7 + $0x20] ss:$16 sps:$4 sm:$0xff]   ;;  %v1436_v22 = vrot.slane %v5430_v20, %v5333_v47 }
 0x283   :  { %3469 = vmatprep.mubr.bf16.mxu0 %v5227_v0  ;;  %3438 = vmatpush1.bf16.msra.mxu0 %v4974_v50 }
 0x284   :  { %3439 = vmatprep.subr.bf16.mxu0 %v4982_v54  ;;  %v4991_v54 = vld [vmem:[#allocation7 + $0x2ac] ss:$16 sps:$4 sm:$0xff]  }
 0x285   :  { %3399 = vmatpush1.bf16.msra.mxu1 %v4929_v23 }
 0x286   :  { %3400 = vmatprep.subr.bf16.mxu1 %v4934_v24 }
 0x287   :  { %3440 = vmatpush1.bf16.msra.mxu0 %v4980_v56  ;;  %v4997_v56 = vld [vmem:[#allocation7 + $0x28c] ss:$16 sps:$4 sm:$0xff]  }
 0x288   :  { %3441 = vmatprep.subr.bf16.mxu0 %v4988_v57  ;;  %v4995_v57 = vld [vmem:[#allocation7 + $0x288] ss:$16 sps:$4 sm:$0xff]  }
 0x289   :  { %3401 = vmatpush1.bf16.msra.mxu1 %v4932_v25 }
 0x28a   :  { %3402 = vmatprep.subr.bf16.mxu1 %v4937_v26 }
 0x28b   :  { %3442 = vmatpush1.bf16.msra.mxu0 %v4986_v60  ;;  %v5009_v60 = vld [vmem:[#allocation7 + $0x24c] ss:$16 sps:$4 sm:$0xff]  }
 0x28c   :  { %3443 = vmatprep.subr.bf16.mxu0 %v4994_v48  ;;  %v5007_v48 = vld [vmem:[#allocation7 + $0x248] ss:$16 sps:$4 sm:$0xff]  }
 0x28d   :  { %3403 = vmatpush1.bf16.msra.mxu1 %v4935_v27 }
 0x28e   :  { %3404 = vmatprep.subr.bf16.mxu1 %v4940_v28 }
 0x28f   :  { %3444 = vmatpush1.bf16.msra.mxu0 %v4992_v63 }
 0x290   :  { %3445 = vmatprep.subr.bf16.mxu0 %v5000_v1 }
 0x291   :  { %3405 = vmatpush1.bf16.msra.mxu1 %v4938_v33 }
 0x292   :  { %3406 = vmatprep.subr.bf16.mxu1 %v4943_v37 }
 0x293   :  { %3446 = vmatpush1.bf16.msra.mxu0 %v4998_v32 }
 0x294   :  { %3447 = vmatprep.subr.bf16.mxu0 %v5006_v3 }
 0x295   :  { %3407 = vmatpush1.bf16.msra.mxu1 %v4941_v29 }
 0x296   :  { %3408 = vmatprep.subr.bf16.mxu1 %v4946_v53 }
 0x297   :  { %3448 = vmatpush1.bf16.msra.mxu0 %v5004_v7 }
 0x298   :  { %3449 = vmatprep.subr.bf16.mxu0 %v5012_v10 }
 0x299   :  { %3409 = vmatpush1.bf16.msra.mxu1 %v4944_v15 }
 0x29a   :  { %3410 = vmatprep.subr.bf16.mxu1 %v4949_v30 }
 0x29b   :  { %3450 = vmatpush1.bf16.msra.mxu0 %v5010_v9 }
 0x29c   :  { %3451 = vmatprep.subr.bf16.mxu0 %v5018_v14 }
 0x29d   :  { %3411 = vmatpush1.bf16.msra.mxu1 %v4947_v31 }
 0x29e   :  { %3412 = vmatprep.subr.bf16.mxu1 %v4952_v34 }
 0x29f   :  { %3452 = vmatpush1.bf16.msra.mxu0 %v5016_v16 }
 0x2a0   :  { %3478 = vmatprep.subr.bf16.mxu0 %v5024_v18 }
 0x2a1   :  { %3413 = vmatpush2.bf16.msra.mxu1 %v4950_v36 }
 0x2a2   :  { %3414 = vmatprep.subr.bf16.mxu1 %v4955_v38 }
 0x2a5   :  { %3415 = vmatpush2.bf16.msra.mxu1 %v4953_v41 }
 0x2a6   :  { %3416 = vmatprep.subr.bf16.mxu1 %v4958_v42 }
 0x2a9   :  { %3417 = vmatpush2.bf16.msra.mxu1 %v4956_v43 }
 0x2aa   :  { %3418 = vmatprep.subr.bf16.mxu1 %v4961_v49  ;;  %v4977_v49 = vld [vmem:[#allocation7 + $0x2e8] ss:$16 sps:$4 sm:$0xff]  }
 0x2ad   :  { %3419 = vmatpush2.bf16.msra.mxu1 %v4959_v52  ;;  %v4983_v52 = vld [vmem:[#allocation7 + $0x2c8] ss:$16 sps:$4 sm:$0xff]  }
 0x2ae   :  { %3420 = vmatprep.subr.bf16.mxu1 %v4964_v55  ;;  %v4989_v55 = vld [vmem:[#allocation7 + $0x2a8] ss:$16 sps:$4 sm:$0xff]  }
 0x2b1   :  { %3421 = vmatpush2.bf16.msra.mxu1 %v4962_v58  ;;  %v5003_v58 = vld [vmem:[#allocation7 + $0x26c] ss:$16 sps:$4 sm:$0xff]  }
 0x2b2   :  { %3422 = vmatprep.subr.bf16.mxu1 %v4967_v59  ;;  %v5001_v59 = vld [vmem:[#allocation7 + $0x268] ss:$16 sps:$4 sm:$0xff]  }
 0x2b5   :  { %3423 = vmatpush2.bf16.msra.mxu1 %v4965_v61  ;;  %v5015_v61 = vld [vmem:[#allocation7 + $0x22c] ss:$16 sps:$4 sm:$0xff]  }
 0x2b6   :  { %3424 = vmatprep.subr.bf16.mxu1 %v4970_v62 }
 0x2b9   :  { %3425 = vmatpush2.bf16.msra.mxu1 %v4968_v2  ;;  %v5021_v2 = vld [vmem:[#allocation7 + $0x20c] ss:$16 sps:$4 sm:$0xff]  }
 0x2ba   :  { %3426 = vmatprep.subr.bf16.mxu1 %v4973_v4 }
 0x2bd   :  { %3427 = vmatpush2.bf16.msra.mxu1 %v4971_v39  ;;  %v5019_v39 = vld [vmem:[#allocation7 + $0x208] ss:$16 sps:$4 sm:$0xff]  }
 0x2be   :  { %3519 = vmatprep.subr.bf16.mxu1 %v4979_v5 }
 0x2c0   :  { %v2502_v35 = vpop.f32.mrf.mxu1 }
 0x2c1   :  { %v2503_v23 = vadd.f32 %v2502_v35, %v1432_v21  ;;  %v1440_v35 = vrot.slane %v5430_v20, %v5330_v46  ;;  %v5027_v20 = vld [vmem:[#allocation7 + $0xcc] ss:$16 sps:$4 sm:$0xff]  }
 0x2c2   :  { %v2504_v6 = vpop.f32.mrf.mxu1  ;;  %v2543_v8 = vpop.f32.mrf.mxu0 }
 0x2c3   :  { %v2505_v24 = vadd.f32 %v2504_v6, %v1436_v22  ;;  %v2544_v25 = vadd.f32 %v2543_v8, %v2503_v23 }
 0x2c4   :  { %v2506_v19 = vpop.f32.mrf.mxu1  ;;  %v2545_v12 = vpop.f32.mrf.mxu0 }
 0x2c5   :  { %v2546_v27 = vadd.f32 %v2545_v12, %v2505_v24 }
 0x2c6   :  { %v2507_v40 = vpop.f32.mrf.mxu1  ;;  %v2547_v13 = vpop.f32.mrf.mxu0 }
 0x2c8   :  { %v2548_v17 = vpop.f32.mrf.mxu0 }
 0x300   :  { %v2584_v26 = vpop.f32.mrf.mxu1 }
 0x301   :  { %v2585_v28 = vadd.f32 %v2584_v26, %v2544_v25  ;;  %v5022_v26 = vld [vmem:[#allocation7 + $0xe8] ss:$16 sps:$4 sm:$0xff]  }
 0x302   :  { %v2586_v33 = vpop.f32.mrf.mxu1  ;;  %v2625_v37 = vpop.f32.mrf.mxu0 }
 0x303   :  { %v2587_v29 = vadd.f32 %v2586_v33, %v2546_v27  ;;  %v2626_v53 = vadd.f32 %v2625_v37, %v2585_v28  ;;  %v5025_v28 = vld [vmem:[#allocation7 + $0xc8] ss:$16 sps:$4 sm:$0xff]   ;;  %v5030_v33 = vld [vmem:[#allocation7 + $0xac] ss:$16 sps:$4 sm:$0xff]  }
 0x304   :  { %v2588_v15 = vpop.f32.mrf.mxu1  ;;  %v2627_v30 = vpop.f32.mrf.mxu0  ;;  %v5028_v37 = vld [vmem:[#allocation7 + $0xa8] ss:$16 sps:$4 sm:$0xff]  }
 0x305   :  { %v2628_v31 = vadd.f32 %v2627_v30, %v2587_v29  ;;  %v2792_v34 = vmax.f32 %v2626_v53, 0.0  ;;  %v5070_v29 = vld [vmem:[#allocation9 + $0x78] sm:$0xff]   ;;  %v5072_v15 = vld [vmem:[#allocation9 + $0x70] sm:$0xff]  }
 0x306   :  { %v2589_v36 = vpop.f32.mrf.mxu1  ;;  %v2629_v38 = vpop.f32.mrf.mxu0  ;;  %v5071_v53 = vld [vmem:[#allocation9 + $0x38] sm:$0xff]  }
 0x307   :  { %v2793_v41 = vmax.f32 %v2628_v31, 0.0  ;;  %v5438_v50 = vpack.c.bf16 %v2792_v34, %v2792_v34  ;;  %v5033_v30 = vld [vmem:[#allocation7 + $0x8c] ss:$16 sps:$4 sm:$0xff]   ;;  %v5073_v31 = vld [vmem:[#allocation9 + $0x30] sm:$0xff]   ;;  %v5031_v34 = vld [vmem:[#allocation7 + $0x88] ss:$16 sps:$4 sm:$0xff]  }
 0x308   :  { %v2630_v42 = vpop.f32.mrf.mxu0  ;;  %v5074_v36 = vld [vmem:[#allocation9 + $0x68] sm:$0xff]  }
 0x309   :  { %v5436_v43 = vpack.c.bf16 %v2793_v41, %v2793_v41  ;;  %v5036_v38 = vld [vmem:[#allocation7 + $0x6c] ss:$16 sps:$4 sm:$0xff]   ;;  %v5034_v42 = vld [vmem:[#allocation7 + $0x68] ss:$16 sps:$4 sm:$0xff]  }
 0x30a   :  { %v5075_v41 = vld [vmem:[#allocation9 + $0x28] sm:$0xff]  }
 0x30b   :  { %3428 = vmatprep.mubr.bf16.mxu1 %v5436_v43 }
 0x30c   :  { %3429 = vmatmul.mubr.bf16.vlgmr.msra.gmra.mxu1 %v5438_v50 }
 0x30d   :  { %3520 = vmatpush1.bf16.msra.mxu1 %v4977_v49  ;;  %3551 = vmatprep.mubr.bf16.mxu1 %v5227_v0  ;;  %v5013_v0 = vld [vmem:[#allocation7 + $0x228] ss:$16 sps:$4 sm:$0xff]   ;;  %v5039_v49 = vld [vmem:[#allocation7 + $0x4c] ss:$16 sps:$4 sm:$0xff]  }
 0x30e   :  { %3521 = vmatprep.subr.bf16.mxu1 %v4985_v51  ;;  %v5077_v51 = vld [vmem:[#allocation9 + $0x20] sm:$0xff]  }
 0x311   :  { %3522 = vmatpush1.bf16.msra.mxu1 %v4983_v52  ;;  %v5037_v52 = vld [vmem:[#allocation7 + $0x48] ss:$16 sps:$4 sm:$0xff]  }
 0x312   :  { %3523 = vmatprep.subr.bf16.mxu1 %v4991_v54  ;;  %v5078_v54 = vld [vmem:[#allocation9 + $0x58] sm:$0xff]  }
 0x315   :  { %3524 = vmatpush1.bf16.msra.mxu1 %v4989_v55  ;;  %v5042_v55 = vld [vmem:[#allocation7 + $0x2c] ss:$16 sps:$4 sm:$0xff]  }
 0x316   :  { %3525 = vmatprep.subr.bf16.mxu1 %v4997_v56  ;;  %v5079_v56 = vld [vmem:[#allocation9 + $0x18] sm:$0xff]  }
 0x319   :  { %3526 = vmatpush1.bf16.msra.mxu1 %v4995_v57  ;;  %v5040_v57 = vld [vmem:[#allocation7 + $0x28] ss:$16 sps:$4 sm:$0xff]  }
 0x31a   :  { %3527 = vmatprep.subr.bf16.mxu1 %v5003_v58  ;;  %v5080_v58 = vld [vmem:[#allocation9 + $0x50] sm:$0xff]  }
 0x31d   :  { %3528 = vmatpush1.bf16.msra.mxu1 %v5001_v59  ;;  %v5045_v59 = vld [vmem:[#allocation7 + $0xc] ss:$16 sps:$4 sm:$0xff]  }
 0x31e   :  { %3529 = vmatprep.subr.bf16.mxu1 %v5009_v60  ;;  %v5081_v60 = vld [vmem:[#allocation9 + $0x10] sm:$0xff]  }
 0x320   :  { %v4376_v62 = vpop.f32.mrf.mxu1 }
 0x321   :  { %3530 = vmatpush1.bf16.msra.mxu1 %v5007_v48  ;;  %v5043_v48 = vld [vmem:[#allocation7 + $0x8] ss:$16 sps:$4 sm:$0xff]  }
 0x322   :  { %v4377_v63 = vpop.f32.mrf.mxu1  ;;  %v4398_v1 = vpop.f32.mrf.mxu0  ;;  %3531 = vmatprep.subr.bf16.mxu1 %v5015_v61  ;;  %v5048_v61 = vld [vmem:[#allocation7 + $0x1ec] ss:$16 sps:$4 sm:$0xff]  }
 0x323   :  { %v4378_v6 = vadd.f32 %v4377_v63, %v4376_v62  ;;  %v5046_v62 = vld [vmem:[#allocation7 + $0x1e8] ss:$16 sps:$4 sm:$0xff]  }
 0x324   :  { %v4379_v4 = vpop.f32.mrf.mxu1  ;;  %v4399_v32 = vpop.f32.mrf.mxu0  ;;  %v5049_v63 = vld [vmem:[#allocation7 + $0x1c8] ss:$16 sps:$4 sm:$0xff]  }
 0x325   :  { %3532 = vmatpush1.bf16.msra.mxu1 %v5013_v0  ;;  %v2667_v8 = vadd.f32 %v4378_v6, %v1440_v35  ;;  %v4400_v10 = vadd.f32 %v4399_v32, %v4398_v1  ;;  %v5051_v0 = vld [vmem:[#allocation7 + $0x1cc] ss:$16 sps:$4 sm:$0xff]   ;;  %v5055_v32 = vld [vmem:[#allocation7 + $0x188] ss:$16 sps:$4 sm:$0xff]  }
 0x326   :  { %v4380_v5 = vpop.f32.mrf.mxu1  ;;  %v4401_v3 = vpop.f32.mrf.mxu0  ;;  %3533 = vmatprep.subr.bf16.mxu1 %v5021_v2  ;;  %v5054_v1 = vld [vmem:[#allocation7 + $0x1ac] ss:$16 sps:$4 sm:$0xff]   ;;  %v5052_v2 = vld [vmem:[#allocation7 + $0x1a8] ss:$16 sps:$4 sm:$0xff]  }
 0x327   :  { %v2707_v40 = vadd.f32 %v4400_v10, %v2667_v8  ;;  %v5057_v4 = vld [vmem:[#allocation7 + $0x18c] ss:$16 sps:$4 sm:$0xff]   ;;  %v5058_v5 = vld [vmem:[#allocation7 + $0x168] ss:$16 sps:$4 sm:$0xff]  }
 0x328   :  { %v4402_v7 = vpop.f32.mrf.mxu0  ;;  %v5063_v3 = vld [vmem:[#allocation7 + $0x14c] ss:$16 sps:$4 sm:$0xff]   ;;  %v5064_v6 = vld [vmem:[#allocation7 + $0x128] ss:$16 sps:$4 sm:$0xff]  }
 0x329   :  { %3534 = vmatpush1.bf16.msra.mxu1 %v5019_v39  ;;  %v5060_v39 = vld [vmem:[#allocation7 + $0x16c] ss:$16 sps:$4 sm:$0xff]   ;;  %v5061_v7 = vld [vmem:[#allocation7 + $0x148] ss:$16 sps:$4 sm:$0xff]  }
 0x32a   :  { %4448 = vmatprep.subr.bf16.mxu1 %v5070_v29  ;;  %v5066_v35 = vld [vmem:[#allocation7 + $0x12c] ss:$16 sps:$4 sm:$0xff]   ;;  %v5067_v10 = vld [vmem:[#allocation7 + $0x108] ss:$16 sps:$4 sm:$0xff]  }
 0x32b   :  { %v5069_v8 = vld [vmem:[#allocation7 + $0x10c] ss:$16 sps:$4 sm:$0xff]  }
 0x340   :  { %v4420_v9 = vpop.f32.mrf.mxu1 }
 0x342   :  { %v4421_v19 = vpop.f32.mrf.mxu1  ;;  %v4442_v12 = vpop.f32.mrf.mxu0 }
 0x343   :  { %v4422_v13 = vadd.f32 %v4421_v19, %v4420_v9  ;;  %v5082_v9 = vld [vmem:[#allocation9 + $0x48] sm:$0xff]  }
 0x344   :  { %v4423_v14 = vpop.f32.mrf.mxu1  ;;  %v4443_v16 = vpop.f32.mrf.mxu0  ;;  %v5083_v19 = vld [vmem:[#allocation9 + $0x8] sm:$0xff]  }
 0x345   :  { %v2747_v17 = vadd.f32 %v4422_v13, %v2707_v40  ;;  %v4444_v18 = vadd.f32 %v4443_v16, %v4442_v12  ;;  %v5084_v12 = vld [vmem:[#allocation9 + $0x40] sm:$0xff]   ;;  %v5086_v13 = vld [vmem:[#allocation9 + $0xf8] sm:$0xff]   ;;  %v5088_v16 = vld [vmem:[#allocation9 + $0xf0] sm:$0xff]  }
 0x346   :  { %v4424_v21 = vpop.f32.mrf.mxu1  ;;  %v4445_v22 = vpop.f32.mrf.mxu0  ;;  %v5085_v40 = vld [vmem:[#allocation9] sm:$0xff]   ;;  %v5087_v14 = vld [vmem:[#allocation9 + $0xb8] sm:$0xff]  }
 0x347   :  { %v2787_v23 = vadd.f32 %v4444_v18, %v2747_v17  ;;  %v5089_v17 = vld [vmem:[#allocation9 + $0xb0] sm:$0xff]   ;;  %v5090_v18 = vld [vmem:[#allocation9 + $0xe8] sm:$0xff]   ;;  %v5093_v22 = vld [vmem:[#allocation9 + $0xa0] sm:$0xff]  }
 0x348   :  { %v4446_v24 = vpop.f32.mrf.mxu0  ;;  %v5091_v21 = vld [vmem:[#allocation9 + $0xa8] sm:$0xff]  }
 0x349   :  { %v2794_v25 = vmax.f32 %v2787_v23, 0.0  ;;  %v5094_v23 = vld [vmem:[#allocation9 + $0xd8] sm:$0xff]  }
 0x34a   :  { %v5095_v24 = vld [vmem:[#allocation9 + $0x98] sm:$0xff]  }
 0x34b   :  { %v2797_v27 = vpack.c.bf16 %v2794_v25, %v2794_v25  ;;  %v5096_v25 = vld [vmem:[#allocation9 + $0xd0] sm:$0xff]  }
 0x34d   :  { %3470 = vmatmul.mubr.bf16.vlgmr.msra.gmra.mxu0 %v2797_v27  ;;  %3552 = vmatmul.mubr.bf16.vlgmr.msra.gmra.mxu1 %v2797_v27  ;;  %v5097_v27 = vld [vmem:[#allocation9 + $0x90] sm:$0xff]  }
 0x34e   :  { %3479 = vmatpush1.bf16.msra.mxu0 %v5022_v26  ;;  %3510 = vmatprep.mubr.bf16.mxu0 %v5436_v43  ;;  %v5076_v43 = vld [vmem:[#allocation9 + $0x60] sm:$0xff]  }
 0x34f   :  { %3480 = vmatprep.subr.bf16.mxu0 %v5027_v20  ;;  %4449 = vmatpush3.bf16.msra.mxu1 %v5071_v53  ;;  %v5100_v53 = vld [vmem:[#allocation9 + $0xc0] sm:$0xff]  }
 0x350   :  { %4450 = vmatprep.subr.bf16.mxu1 %v5072_v15  ;;  %v5101_v15 = vld [vmem:[#allocation9 + $0x80] sm:$0xff]  }
 0x352   :  { %3481 = vmatpush1.bf16.msra.mxu0 %v5025_v28  ;;  %v5098_v28 = vld [vmem:[#allocation9 + $0xc8] sm:$0xff]  }
 0x353   :  { %3482 = vmatprep.subr.bf16.mxu0 %v5030_v33  ;;  %4451 = vmatpush3.bf16.msra.mxu1 %v5073_v31 }
 0x354   :  { %4452 = vmatprep.subr.bf16.mxu1 %v5074_v36 }
 0x356   :  { %3483 = vmatpush1.bf16.msra.mxu0 %v5028_v37  ;;  %v5099_v37 = vld [vmem:[#allocation9 + $0x88] sm:$0xff]  }
 0x357   :  { %3484 = vmatprep.subr.bf16.mxu0 %v5033_v30  ;;  %4453 = vmatpush3.bf16.msra.mxu1 %v5075_v41  ;;  %v2894_v30 = vld [vmem:[%s5469_s8] sm:$0xf] }
 0x358   :  { %4454 = vmatprep.subr.bf16.mxu1 %v5076_v43  ;;  %v2899_v31 = vrot.slane %v2894_v30, %v5327_v45  ;;  %v2907_v45 = vrot.slane %v2894_v30, %v5330_v46 }
 0x35a   :  { %3485 = vmatpush1.bf16.msra.mxu0 %v5031_v34  ;;  %v2903_v34 = vrot.slane %v2894_v30, %v5333_v47  ;;  %v2911_v47 = vrot.slane %v2894_v30, %v167_v11  ;;  %v4322_v11 = vld [vmem:[%s5471_s10] ss:$0 sm:$0xff] }
 0x35b   :  { %3486 = vmatprep.subr.bf16.mxu0 %v5036_v38  ;;  %4455 = vmatpush3.bf16.msra.mxu1 %v5077_v51 }
 0x35c   :  { %4456 = vmatprep.subr.bf16.mxu1 %v5078_v54 }
 0x35e   :  { %3487 = vmatpush1.bf16.msra.mxu0 %v5034_v42 }
 0x35f   :  { %3488 = vmatprep.subr.bf16.mxu0 %v5039_v49  ;;  %4457 = vmatpush3.bf16.msra.mxu1 %v5079_v56 }
 0x360   :  { %4458 = vmatprep.subr.bf16.mxu1 %v5080_v58 }
 0x362   :  { %3489 = vmatpush1.bf16.msra.mxu0 %v5037_v52 }
 0x363   :  { %3490 = vmatprep.subr.bf16.mxu0 %v5042_v55  ;;  %4459 = vmatpush3.bf16.msra.mxu1 %v5081_v60 }
 0x364   :  { %4460 = vmatprep.subr.bf16.mxu1 %v5082_v9 }
 0x366   :  { %3491 = vmatpush1.bf16.msra.mxu0 %v5040_v57 }
 0x367   :  { %3492 = vmatprep.subr.bf16.mxu0 %v5045_v59  ;;  %4461 = vmatpush3.bf16.msra.mxu1 %v5083_v19 }
 0x368   :  { %4462 = vmatprep.subr.bf16.mxu1 %v5084_v12 }
 0x36a   :  { %3493 = vmatpush1.bf16.msra.mxu0 %v5043_v48 }
 0x36b   :  { %3494 = vmatprep.subr.bf16.mxu0 %v5048_v61  ;;  %4463 = vmatpush3.bf16.msra.mxu1 %v5085_v40 }
 0x36e   :  { %3495 = vmatpush2.bf16.msra.mxu0 %v5046_v62 }
 0x36f   :  { %3496 = vmatprep.subr.bf16.mxu0 %v5051_v0 }
 0x372   :  { %3497 = vmatpush2.bf16.msra.mxu0 %v5049_v63 }
 0x373   :  { %3498 = vmatprep.subr.bf16.mxu0 %v5054_v1 }
 0x376   :  { %3499 = vmatpush2.bf16.msra.mxu0 %v5052_v2 }
 0x377   :  { %3500 = vmatprep.subr.bf16.mxu0 %v5057_v4 }
 0x37a   :  { %3501 = vmatpush2.bf16.msra.mxu0 %v5055_v32 }
 0x37b   :  { %3502 = vmatprep.subr.bf16.mxu0 %v5060_v39 }
 0x37e   :  { %3503 = vmatpush2.bf16.msra.mxu0 %v5058_v5 }
 0x37f   :  { %3504 = vmatprep.subr.bf16.mxu0 %v5063_v3 }
 0x382   :  { %3505 = vmatpush2.bf16.msra.mxu0 %v5061_v7 }
 0x383   :  { %3506 = vmatprep.subr.bf16.mxu0 %v5066_v35 }
 0x386   :  { %3507 = vmatpush2.bf16.msra.mxu0 %v5064_v6 }
 0x387   :  { %3508 = vmatprep.subr.bf16.mxu0 %v5069_v8 }
 0x38a   :  { %3509 = vmatpush2.bf16.msra.mxu0 %v5067_v10 }
 0x38b   :  { %4470 = vmatprep.subr.bf16.mxu0 %v5086_v13 }
 0x38d   :  { %3511 = vmatmul.mubr.bf16.vlgmr.msra.gmra.mxu0 %v5438_v50  ;;  %v5092_v50 = vld [vmem:[#allocation9 + $0xe0] sm:$0xff]  }
 0x38e   :  { %4471 = vmatpush3.bf16.msra.mxu0 %v5087_v14 }
 0x38f   :  { %4472 = vmatprep.subr.bf16.mxu0 %v5088_v16 }
 0x392   :  { %4473 = vmatpush3.bf16.msra.mxu0 %v5089_v17 }
 0x393   :  { %4474 = vmatprep.subr.bf16.mxu0 %v5090_v18 }
 0x396   :  { %4475 = vmatpush3.bf16.msra.mxu0 %v5091_v21 }
 0x397   :  { %4476 = vmatprep.subr.bf16.mxu0 %v5092_v50 }
 0x39a   :  { %4477 = vmatpush3.bf16.msra.mxu0 %v5093_v22 }
 0x39b   :  { %4478 = vmatprep.subr.bf16.mxu0 %v5094_v23 }
 0x39e   :  { %4479 = vmatpush3.bf16.msra.mxu0 %v5095_v24 }
 0x39f   :  { %4480 = vmatprep.subr.bf16.mxu0 %v5096_v25 }
 0x3a2   :  { %4481 = vmatpush3.bf16.msra.mxu0 %v5097_v27 }
 0x3a3   :  { %4482 = vmatprep.subr.bf16.mxu0 %v5098_v28 }
 0x3a6   :  { %4483 = vmatpush3.bf16.msra.mxu0 %v5099_v37 }
 0x3a7   :  { %4484 = vmatprep.subr.bf16.mxu0 %v5100_v53 }
 0x3aa   :  { %4485 = vmatpush3.bf16.msra.mxu0 %v5101_v15 }
 0x3cc   :  { %v3430_v26 = vpop.f32.mrf.mxu1 }
 0x3cd   :  { %v3431_v36 = vadd.f32 %v3430_v26, %v2899_v31 }
 0x3ce   :  { %v3432_v20 = vpop.f32.mrf.mxu1 }
 0x3cf   :  { %v3433_v42 = vadd.f32 %v3432_v20, %v2903_v34 }
 0x3d0   :  { %v3434_v33 = vpop.f32.mrf.mxu1 }
 0x3d2   :  { %v3435_v29 = vpop.f32.mrf.mxu1 }
 0x40d   :  { %v3471_v38 = vpop.f32.mrf.mxu0  ;;  %v3553_v41 = vpop.f32.mrf.mxu1 }
 0x40e   :  { %v3472_v43 = vadd.f32 %v3471_v38, %v3431_v36 }
 0x40f   :  { %v3473_v49 = vpop.f32.mrf.mxu0  ;;  %v3555_v51 = vpop.f32.mrf.mxu1 }
 0x410   :  { %v3474_v52 = vadd.f32 %v3473_v49, %v3433_v42  ;;  %v3560_v54 = vmax.f32 %v3472_v43, 0.0 }
 0x411   :  { %v3475_v55 = vpop.f32.mrf.mxu0  ;;  %v3557_v56 = vpop.f32.mrf.mxu1 }
 0x412   :  { %v3561_v57 = vmax.f32 %v3474_v52, 0.0  ;;  %v3564_v48 = vpack.c.bf16 %v3560_v54, %v3560_v54 }
 0x413   :  { %v3476_v58 = vpop.f32.mrf.mxu0  ;;  %v3558_v59 = vpop.f32.mrf.mxu1 }
 0x414   :  { %v3565_v60 = vpack.c.bf16 %v3561_v57, %v3561_v57 }
 0x416   :  { %3863 = vmatprep.mubr.bf16.mxu1 %v3565_v60 }
 0x417   :  { %3864 = vmatmul.mubr.bf16.vlgmr.msra.gmra.mxu1 %v3564_v48 }
 0x44d   :  { %v3512_v61 = vpop.f32.mrf.mxu0 }
 0x44e   :  { %v3513_v62 = vadd.f32 %v3512_v61, %v2907_v45 }
 0x44f   :  { %v3514_v0 = vpop.f32.mrf.mxu0 }
 0x450   :  { %v3554_v63 = vadd.f32 %v3553_v41, %v3513_v62  ;;  %v3515_v1 = vadd.f32 %v3514_v0, %v2911_v47 }
 0x451   :  { %v3516_v2 = vpop.f32.mrf.mxu0 }
 0x452   :  { %v3556_v4 = vadd.f32 %v3555_v51, %v3515_v1  ;;  %v3562_v32 = vmax.f32 %v3554_v63, 0.0 }
 0x453   :  { %v3517_v39 = vpop.f32.mrf.mxu0 }
 0x454   :  { %v3563_v5 = vmax.f32 %v3556_v4, 0.0  ;;  %v3566_v7 = vpack.c.bf16 %v3562_v32, %v3562_v32 }
 0x456   :  { %v3567_v3 = vpack.c.bf16 %v3563_v5, %v3563_v5 }
 0x458   :  { %3903 = vmatprep.mubr.bf16.mxu0 %v3567_v3 }
 0x459   :  { %3904 = vmatmul.mubr.bf16.vlgmr.msra.gmra.mxu0 %v3566_v7 }
 0x4d7   :  { %v4464_v35 = vpop.f32.mrf.mxu1 }
 0x4d9   :  { %v4465_v6 = vpop.f32.mrf.mxu1 }
 0x4da   :  { %v4466_v46 = vadd.f32 %v4465_v6, %v4464_v35 }
 0x4db   :  { %v4467_v8 = vpop.f32.mrf.mxu1 }
 0x4dc   :  { %v3866_v19 = vadd.f32 %v4466_v46, %v4322_v11 }
 0x4dd   :  { %v4468_v44 = vpop.f32.mrf.mxu1 }
 0x519   :  { %v4486_v10 = vpop.f32.mrf.mxu0 }
 0x51b   :  { %v4487_v9 = vpop.f32.mrf.mxu0 }
 0x51c   :  { %v4488_v12 = vadd.f32 %v4487_v9, %v4486_v10 }
 0x51d   :  { %v4489_v40 = vpop.f32.mrf.mxu0 }
 0x51e   :  { %v3906_v13 = vadd.f32 %v4488_v12, %v3866_v19 }
 0x51f   :  { %v4490_v14 = vpop.f32.mrf.mxu0 }
 0x520   :  { %3911 = vmax.xlane.f32.xlu0 %v3906_v13 }
 0x5a9   :  { %v3912_v16 = vpop.xlane.xlu0 %3911 }
 0x5aa   :  { %v3913_v17 = vsub.f32 %v3906_v13, %v3912_v16 }
 0x5ac   :  { %v3914_v18 = vmul.f32 1.442695, %v3913_v17 }
 0x5ae   :  { %5102 = vpow2.f32 %v3914_v18 }
 0x5bb   :  { %v5103_v21 = vpop.eup %5102 }
 0x5bc   :  { %3916 = vadd.xlane.f32.xlu0 %v5103_v21 }
 0x645   :  { %v3917_v50 = vpop.xlane.xlu0 %3916 }
 0x646   :  { %5104 = vrcp.f32 %v3917_v50 }
 0x653   :  { %v5105_v22 = vpop.eup %5104 }
 0x654   :  { %v3919_v23 = vmul.f32 %v5105_v22, %v5103_v21 }
 0x656   :  { %3920 = vst [vmem:[%s5472_s11] sm:$0xff] %v3919_v23 }
 0x657   :  { %3925 = vsyncpa [#allocation3], 1 }
 0x658   :  { %3926 = vsyncpa [#allocation5], 1 }
 0x659   :  { %3927 = vsyncpa [#allocation8], 1 }

</bundles_post_ra>
